<compile_context>
chip_gen: v7x
topology: tpu7x:2x2x1
jax: 0.10.0
libtpu: 0.0.40
codegen_flags: <defaults>
</compile_context>

<pallas_src>
import math

import jax
import jax.numpy as jnp
from jax.experimental import pallas as pl
from jax.experimental.pallas import tpu as pltpu


def _round_up(n, m):
    return ((n + m - 1) // m) * m


# --------------------------------------------------------------------------
# Fused kernel: all GRU layers + final Linear in a single invocation.
# --------------------------------------------------------------------------
def _make_fused_gru_kernel(*, num_layers, S, Btile, H, G, mm_dtype, unroll):
    n_in = 1 + 4 * num_layers + 2  # x2d, per-layer (wih, whh, bih, bhh), wfc, bfc

    def kernel(*refs):
        x_ref = refs[0]

        def lrefs(layer):
            b = 1 + 4 * layer
            return refs[b], refs[b + 1], refs[b + 2], refs[b + 3]

        wfc_ref = refs[1 + 4 * num_layers]
        bfc_ref = refs[2 + 4 * num_layers]
        out_ref = refs[n_in]
        gi_scr = refs[n_in + 1]          # (S*Btile, G): input-gate pre-activations

        # (1) Layer-0 input projection hoisted out of the recurrence:
        #     ONE (S*Btile, I) x (I, G) MXU matmul covering every timestep.
        wih0_ref, _, bih0_ref, _ = lrefs(0)
        gi_scr[...] = (jnp.dot(x_ref[...], wih0_ref[...],
                               preferred_element_type=jnp.float32)
                       + bih0_ref[...]).astype(gi_scr.dtype)

        def gates(a):  # contiguous [r|z|n] packing; static lane-offset slices
            return a[:, 0:H], a[:, H:2 * H], a[:, 2 * H:3 * H]

        h_last = jnp.zeros((Btile, H), jnp.float32)
        for layer in range(num_layers):
            _, whh_ref, _, bhh_ref = lrefs(layer)
            has_next = layer + 1 < num_layers
            if has_next:
                wih_nxt_ref, _, bih_nxt_ref, _ = lrefs(layer + 1)
                bih_nxt = jnp.broadcast_to(bih_nxt_ref[...], (Btile, G))  # hoisted
            else:
                wih_nxt_ref, bih_nxt = None, None
            bhh = jnp.broadcast_to(bhh_ref[...], (Btile, G))              # hoisted

            def step(t, h):
                off = pl.multiple_of(t * Btile, Btile)     # sublane-aligned
                gi = gi_scr[pl.ds(off, Btile), :].astype(jnp.float32)
                gh = jnp.dot(h.astype(mm_dtype), whh_ref[...],
                             preferred_element_type=jnp.float32) + bhh
                i_r, i_z, i_n = gates(gi)
                h_r, h_z, h_n = gates(gh)
                r = jax.nn.sigmoid(i_r + h_r)
                z = jax.nn.sigmoid(i_z + h_z)
                n = jnp.tanh(i_n + r * h_n)   # b_hn folded into gh (PyTorch semantics)
                h_new = (1.0 - z) * n + z * h
                if has_next:
                    # (2) Fuse the NEXT layer's input projection into this
                    # step's MXU slack; gi_scr[t] was already consumed so the
                    # in-place overwrite is safe.
                    nxt = jnp.dot(h_new.astype(mm_dtype), wih_nxt_ref[...],
                                  preferred_element_type=jnp.float32) + bih_nxt
                    gi_scr[pl.ds(off, Btile), :] = nxt.astype(gi_scr.dtype)
                return h_new

            h_last = jax.lax.fori_loop(0, S, step,
                                       jnp.zeros((Btile, H), jnp.float32),
                                       unroll=unroll)

        # Dropout is eval-mode identity; Linear head fused onto the last state.
        out_ref[...] = (jnp.dot(h_last.astype(mm_dtype), wfc_ref[...],
                                preferred_element_type=jnp.float32)
                        + bfc_ref[...]).astype(out_ref.dtype)

    return kernel


def _fused_gru_call(x2d, layer_params, wfc, bfc, *, S, Bp, Btile, H, G, Op, mm_dtype):
    num_layers = len(layer_params)
    n_btiles = Bp // Btile
    # Sweep {4, 8, 16} for long S; full unroll only for short sequences.
    unroll = int(S) if S <= 16 else 8

    vmem_space = pl.BlockSpec(memory_space=pltpu.MemorySpace.VMEM)
    in_arrays = [x2d]
    in_specs = [pl.BlockSpec((S * Btile, x2d.shape[1]), lambda b: (b, 0))]
    for lp in layer_params:
        for name in ("wih", "whh", "bih", "bhh"):
            in_arrays.append(lp[name])
            in_specs.append(vmem_space)       # whole-array VMEM, no double-buffer
    in_arrays += [wfc, bfc]
    in_specs += [vmem_space, vmem_space]

    # Explicit VMEM budget (default scoped limit is only ~16/32 MiB).
    def nbytes(a):
        return int(a.size) * jnp.dtype(a.dtype).itemsize

    scratch_b = S * Btile * G * jnp.dtype(mm_dtype).itemsize
    fixed_b = sum(nbytes(a) for a in in_arrays[1:])
    stream_b = 2 * (S * Btile * x2d.shape[1] * jnp.dtype(x2d.dtype).itemsize
                    + Btile * Op * 4)
    vmem_limit = int(1.5 * (scratch_b + fixed_b + stream_b)) + (4 << 20)
    vmem_limit = min(max(vmem_limit, 32 << 20), 112 << 20)

    kernel = _make_fused_gru_kernel(num_layers=num_layers, S=S, Btile=Btile,
                                    H=H, G=G, mm_dtype=mm_dtype, unroll=unroll)
    return pl.pallas_call(
        kernel,
        out_shape=jax.ShapeDtypeStruct((Bp, Op), jnp.float32),
        grid=(n_btiles,),
        in_specs=in_specs,
        out_specs=pl.BlockSpec((Btile, Op), lambda b: (b, 0)),
        scratch_shapes=[pltpu.VMEM((S * Btile, G), mm_dtype)],
        compiler_params=pltpu.CompilerParams(
            dimension_semantics=("parallel",),   # batch tiles -> both TCs on v7x
            vmem_limit_bytes=vmem_limit),
    )(*in_arrays)


# --------------------------------------------------------------------------
# Parameter packing: PyTorch layout -> transposed, contiguous gates, optional bf16
# --------------------------------------------------------------------------
def _pack_gate_matrix(w, G, dtype):
    """w: (3H, in_dim), gates [r; z; n] -> (in_dim, G) transposed, 3H lane-padded to G."""
    three_h, in_dim = w.shape
    out = jnp.zeros((in_dim, G), dtype)
    return out.at[:, :three_h].set(w.T.astype(dtype))


def _pack_gate_bias(b, G):
    out = jnp.zeros((1, G), jnp.float32)
    return out.at[0, :b.shape[0]].set(b.astype(jnp.float32))


def prepare_params(raw, compute_dtype=jnp.bfloat16):
    """Pack raw PyTorch-layout weights for the fused kernel.

    compute_dtype controls MXU-operand / gi-scratch dtype (bf16 default: 2x MXU
    throughput + half the VMEM, with f32 accumulation and f32 gate math;
    f32 for exact parity).
    """
    H = raw["gru"][0]["w_hh"].shape[1]
    G = _round_up(3 * H, 128)   # pad the *packed* 3H, not each gate
    layers = []
    for layer in raw["gru"]:
        layers.append(dict(
            wih=_pack_gate_matrix(layer["w_ih"], G, compute_dtype),  # (in_dim, G)
            whh=_pack_gate_matrix(layer["w_hh"], G, compute_dtype),  # (H, G)
            bih=_pack_gate_bias(layer["b_ih"], G),
            bhh=_pack_gate_bias(layer["b_hh"], G),
        ))
    O = raw["fc_w"].shape[0]
    Op = _round_up(O, 128)
    wfc = jnp.zeros((H, Op), compute_dtype).at[:, :O].set(
        raw["fc_w"].T.astype(compute_dtype))
    bfc = jnp.zeros((1, Op), jnp.float32).at[0, :O].set(
        raw["fc_b"].astype(jnp.float32))
    return dict(layers=layers, wfc=wfc, bfc=bfc,
                output_size=O, hidden_size=H, G=G)


# --------------------------------------------------------------------------
# Full model forward (eval mode)
# --------------------------------------------------------------------------
def gru_model_forward(x, prepared):
    """x: (batch, seq, input_size) -> (batch, output_size)."""
    layers = prepared["layers"]
    mm_dtype = prepared["wfc"].dtype
    H = prepared["hidden_size"]
    G = prepared["G"]
    Op = prepared["wfc"].shape[1]
    O = prepared["output_size"]
    B, S, I = x.shape

    # Batch tiling: split across the grid ("parallel" -> both TensorCores on
    # v7x) only once each tile keeps >=128 rows, so single-TC chips don't pay
    # an extra serial recurrence.
    Bp0 = _round_up(B, 8)
    n_btiles = 2 if Bp0 >= 256 else 1
    Bp = _round_up(B, 8 * n_btiles)
    Btile = Bp // n_btiles

    # Time-major, batch-padded input at its REAL feature width (no zero
    # padding of I to 128 -> no inflated HBM DMA); tiles laid out contiguously
    # so each grid step sees one dense (S*Btile, I) slab.
    x_tm = jnp.transpose(x, (1, 0, 2)).astype(mm_dtype)       # (S, B, I)
    x_tm = jnp.pad(x_tm, ((0, 0), (0, Bp - B), (0, 0)))       # (S, Bp, I)
    x2d = (x_tm.reshape(S, n_btiles, Btile, I)
               .transpose(1, 0, 2, 3)
               .reshape(n_btiles * S * Btile, I))

    out_p = _fused_gru_call(x2d, layers, prepared["wfc"], prepared["bfc"],
                            S=S, Bp=Bp, Btile=Btile, H=H, G=G, Op=Op,
                            mm_dtype=mm_dtype)
    return out_p[:B, :O]


# --------------------------------------------------------------------------
# Deterministic PyTorch-style init (raw layout) + pure-JAX reference
# --------------------------------------------------------------------------
def init_raw_params(key, input_size, hidden_size, num_layers, output_size):
    k = 1.0 / math.sqrt(hidden_size)
    raw = {"gru": []}
    for layer in range(num_layers):
        in_dim = input_size if layer == 0 else hidden_size
        key, k1, k2, k3, k4 = jax.random.split(key, 5)
        raw["gru"].append(dict(
            w_ih=jax.random.uniform(k1, (3 * hidden_size, in_dim), jnp.float32, -k, k),
            w_hh=jax.random.uniform(k2, (3 * hidden_size, hidden_size), jnp.float32, -k, k),
            b_ih=jax.random.uniform(k3, (3 * hidden_size,), jnp.float32, -k, k),
            b_hh=jax.random.uniform(k4, (3 * hidden_size,), jnp.float32, -k, k),
        ))
    key, k5, k6 = jax.random.split(key, 3)
    raw["fc_w"] = jax.random.uniform(k5, (output_size, hidden_size), jnp.float32, -k, k)
    raw["fc_b"] = jax.random.uniform(k6, (output_size,), jnp.float32, -k, k)
    return raw


def reference_forward(x, raw):
    B = x.shape[0]
    hp = jax.lax.Precision.HIGHEST
    h_seq = x.astype(jnp.float32)
    for layer in raw["gru"]:
        w_ih, w_hh, b_ih, b_hh = layer["w_ih"], layer["w_hh"], layer["b_ih"], layer["b_hh"]
        H = w_hh.shape[1]
        h = jnp.zeros((B, H), jnp.float32)
        outs = []
        for t in range(h_seq.shape[1]):
            x_t = h_seq[:, t, :]
            gi = jnp.dot(x_t, w_ih.T, precision=hp) + b_ih
            gh = jnp.dot(h, w_hh.T, precision=hp) + b_hh
            i_r, i_z, i_n = jnp.split(gi, 3, axis=1)
            h_r, h_z, h_n = jnp.split(gh, 3, axis=1)
            r = jax.nn.sigmoid(i_r + h_r)
            z = jax.nn.sigmoid(i_z + h_z)
            n = jnp.tanh(i_n + r * h_n)
            h = (1.0 - z) * n + z * h
            outs.append(h)
        h_seq = jnp.stack(outs, axis=1)
    last = h_seq[:, -1, :]
    return jnp.dot(last, raw["fc_w"].T, precision=hp) + raw["fc_b"]


if __name__ == "__main__":
    batch, seq_len = 2, 8
    input_size, hidden_size, num_layers, output_size = 4, 32, 2, 1

    key = jax.random.PRNGKey(0)
    key, xk = jax.random.split(key)
    x = jax.random.normal(xk, (batch, seq_len, input_size), jnp.float32)

    raw = init_raw_params(key, input_size, hidden_size, num_layers, output_size)
    ref = reference_forward(x, raw)

    # f32 MXU path: tight parity with the reference.
    prepared_f32 = prepare_params(raw, jnp.float32)
    out_f32 = jax.block_until_ready(gru_model_forward(x, prepared_f32))
    assert out_f32.shape == (batch, output_size)
    assert jnp.allclose(out_f32, ref, atol=1e-3, rtol=1e-3), (out_f32, ref)

    # Default bf16 MXU path (f32 accumulation, f32 gate math): loose tolerance.
    prepared_bf16 = prepare_params(raw)
    out_bf16 = jax.block_until_ready(gru_model_forward(x, prepared_bf16))
    assert out_bf16.shape == (batch, output_size)
    assert jnp.allclose(out_bf16, ref, atol=1e-1, rtol=1e-1), (out_bf16, ref)

    print("KERNEL_OK")
</pallas_src>

<mosaic_0001>
module attributes {stable_mosaic.version = 11 : i64} {
  func.func @kernel(%arg0: i32, %arg1: memref<64x4xf32, #tpu.memory_space<vmem>>, %arg2: memref<4x128xf32, #tpu.memory_space<vmem>>, %arg3: memref<32x128xf32, #tpu.memory_space<vmem>>, %arg4: memref<1x128xf32, #tpu.memory_space<vmem>>, %arg5: memref<1x128xf32, #tpu.memory_space<vmem>>, %arg6: memref<32x128xf32, #tpu.memory_space<vmem>>, %arg7: memref<32x128xf32, #tpu.memory_space<vmem>>, %arg8: memref<1x128xf32, #tpu.memory_space<vmem>>, %arg9: memref<1x128xf32, #tpu.memory_space<vmem>>, %arg10: memref<32x128xf32, #tpu.memory_space<vmem>>, %arg11: memref<1x128xf32, #tpu.memory_space<vmem>>, %arg12: memref<8x128xf32, #tpu.memory_space<vmem>>, %arg13: memref<64x128xf32, #tpu.memory_space<vmem>>) attributes {dimension_semantics = [#tpu.dimension_semantics<parallel>], iteration_bounds = array<i64: 1>, scalar_prefetch = 0 : i64, scratch_operands = 1 : i64, tpu.core_type = #tpu.core_type<tc>, window_params = [{transform_indices = @transform_0, window_bounds = array<i64: 64, 4>}, {pipeline_mode = #tpu.pipeline_mode<synchronous>, transform_indices = @transform_1, window_bounds = array<i64: 4, 128>}, {pipeline_mode = #tpu.pipeline_mode<synchronous>, transform_indices = @transform_2, window_bounds = array<i64: 32, 128>}, {pipeline_mode = #tpu.pipeline_mode<synchronous>, transform_indices = @transform_3, window_bounds = array<i64: 1, 128>}, {pipeline_mode = #tpu.pipeline_mode<synchronous>, transform_indices = @transform_4, window_bounds = array<i64: 1, 128>}, {pipeline_mode = #tpu.pipeline_mode<synchronous>, transform_indices = @transform_5, window_bounds = array<i64: 32, 128>}, {pipeline_mode = #tpu.pipeline_mode<synchronous>, transform_indices = @transform_6, window_bounds = array<i64: 32, 128>}, {pipeline_mode = #tpu.pipeline_mode<synchronous>, transform_indices = @transform_7, window_bounds = array<i64: 1, 128>}, {pipeline_mode = #tpu.pipeline_mode<synchronous>, transform_indices = @transform_8, window_bounds = array<i64: 1, 128>}, {pipeline_mode = #tpu.pipeline_mode<synchronous>, transform_indices = @transform_9, window_bounds = array<i64: 32, 128>}, {pipeline_mode = #tpu.pipeline_mode<synchronous>, transform_indices = @transform_10, window_bounds = array<i64: 1, 128>}, {transform_indices = @transform_11, window_bounds = array<i64: 8, 128>}]} {
    %c0 = arith.constant 0 : index
    %c0_0 = arith.constant 0 : index
    %0 = vector.load %arg1[%c0, %c0_0] : memref<64x4xf32, #tpu.memory_space<vmem>>, vector<64x4xf32>
    %c0_1 = arith.constant 0 : index
    %c0_2 = arith.constant 0 : index
    %1 = vector.load %arg2[%c0_1, %c0_2] : memref<4x128xf32, #tpu.memory_space<vmem>>, vector<4x128xf32>
    %cst = arith.constant dense<0.000000e+00> : vector<64x128xf32>
    %2 = tpu.matmul %0, %1, %cst {dimension_numbers = #tpu.dot_dimension_numbers<[1], [0], [0], [1], [0, 0, 1, 1], [], []>} : vector<64x4xf32>, vector<4x128xf32>, vector<64x128xf32> -> vector<64x128xf32>
    %c0_3 = arith.constant 0 : index
    %c0_4 = arith.constant 0 : index
    %3 = vector.load %arg4[%c0_3, %c0_4] : memref<1x128xf32, #tpu.memory_space<vmem>>, vector<1x128xf32>
    %4 = vector.broadcast %3 : vector<1x128xf32> to vector<64x128xf32>
    %5 = arith.addf %2, %4 : vector<64x128xf32>
    %c0_5 = arith.constant 0 : index
    %c0_6 = arith.constant 0 : index
    %6 = vector.load %arg13[%c0_5, %c0_6] : memref<64x128xf32, #tpu.memory_space<vmem>>, vector<64x128xf32>
    tpu.vector_store %arg13[%c0_5, %c0_6], %5 {strides = array<i32>} : memref<64x128xf32, #tpu.memory_space<vmem>>, vector<64x128xf32>,
    %c0_7 = arith.constant 0 : index
    %c0_8 = arith.constant 0 : index
    %7 = vector.load %arg8[%c0_7, %c0_8] : memref<1x128xf32, #tpu.memory_space<vmem>>, vector<1x128xf32>
    %8 = vector.shape_cast %7 : vector<1x128xf32> to vector<1x128xf32>
    %9 = vector.broadcast %8 : vector<1x128xf32> to vector<8x128xf32>
    %c0_9 = arith.constant 0 : index
    %c0_10 = arith.constant 0 : index
    %10 = vector.load %arg5[%c0_9, %c0_10] : memref<1x128xf32, #tpu.memory_space<vmem>>, vector<1x128xf32>
    %11 = vector.shape_cast %10 : vector<1x128xf32> to vector<1x128xf32>
    %12 = vector.broadcast %11 : vector<1x128xf32> to vector<8x128xf32>
    %cst_11 = arith.constant 0.000000e+00 : f32
    %13 = vector.broadcast %cst_11 : f32 to vector<8x32xf32>
    %c0_i32 = arith.constant 0 : i32
    %c8_i32 = arith.constant 8 : i32
    %14 = arith.muli %c0_i32, %c8_i32 : i32
    %15 = tpu.assume_multiple %14, 8 : i32
    %16 = arith.index_cast %15 : i32 to index
    %c0_12 = arith.constant 0 : index
    %17 = vector.load %arg13[%16, %c0_12] : memref<64x128xf32, #tpu.memory_space<vmem>>, vector<8x128xf32>
    %c0_13 = arith.constant 0 : index
    %c0_14 = arith.constant 0 : index
    %18 = vector.load %arg3[%c0_13, %c0_14] : memref<32x128xf32, #tpu.memory_space<vmem>>, vector<32x128xf32>
    %cst_15 = arith.constant dense<0.000000e+00> : vector<8x128xf32>
    %19 = tpu.matmul %13, %18, %cst_15 {dimension_numbers = #tpu.dot_dimension_numbers<[1], [0], [0], [1], [0, 0, 1, 1], [], []>} : vector<8x32xf32>, vector<32x128xf32>, vector<8x128xf32> -> vector<8x128xf32>
    %20 = arith.addf %19, %12 : vector<8x128xf32>
    %21 = vector.extract_strided_slice %17 {offsets = [0, 0], sizes = [8, 32], strides = [1, 1]} : vector<8x128xf32> to vector<8x32xf32>
    %22 = vector.extract_strided_slice %17 {offsets = [0, 32], sizes = [8, 32], strides = [1, 1]} : vector<8x128xf32> to vector<8x32xf32>
    %23 = vector.extract_strided_slice %17 {offsets = [0, 64], sizes = [8, 32], strides = [1, 1]} : vector<8x128xf32> to vector<8x32xf32>
    %24 = vector.extract_strided_slice %20 {offsets = [0, 0], sizes = [8, 32], strides = [1, 1]} : vector<8x128xf32> to vector<8x32xf32>
    %25 = vector.extract_strided_slice %20 {offsets = [0, 32], sizes = [8, 32], strides = [1, 1]} : vector<8x128xf32> to vector<8x32xf32>
    %26 = vector.extract_strided_slice %20 {offsets = [0, 64], sizes = [8, 32], strides = [1, 1]} : vector<8x128xf32> to vector<8x32xf32>
    %27 = arith.addf %21, %24 : vector<8x32xf32>
    %28 = arith.negf %27 : vector<8x32xf32>
    %29 = math.exp %28 : vector<8x32xf32>
    %cst_16 = arith.constant 1.000000e+00 : f32
    %30 = vector.broadcast %cst_16 : f32 to vector<8x32xf32>
    %31 = arith.addf %30, %29 : vector<8x32xf32>
    %32 = arith.divf %30, %31 : vector<8x32xf32>
    %33 = arith.addf %22, %25 : vector<8x32xf32>
    %34 = arith.negf %33 : vector<8x32xf32>
    %35 = math.exp %34 : vector<8x32xf32>
    %cst_17 = arith.constant 1.000000e+00 : f32
    %36 = vector.broadcast %cst_17 : f32 to vector<8x32xf32>
    %37 = arith.addf %36, %35 : vector<8x32xf32>
    %38 = arith.divf %36, %37 : vector<8x32xf32>
    %39 = arith.mulf %32, %26 : vector<8x32xf32>
    %40 = arith.addf %23, %39 : vector<8x32xf32>
    %41 = math.tanh %40 : vector<8x32xf32>
    %cst_18 = arith.constant 1.000000e+00 : f32
    %42 = vector.broadcast %cst_18 : f32 to vector<8x32xf32>
    %43 = arith.subf %42, %38 : vector<8x32xf32>
    %44 = arith.mulf %43, %41 : vector<8x32xf32>
    %45 = arith.mulf %38, %13 : vector<8x32xf32>
    %46 = arith.addf %44, %45 : vector<8x32xf32>
    %c0_19 = arith.constant 0 : index
    %c0_20 = arith.constant 0 : index
    %47 = vector.load %arg6[%c0_19, %c0_20] : memref<32x128xf32, #tpu.memory_space<vmem>>, vector<32x128xf32>
    %cst_21 = arith.constant dense<0.000000e+00> : vector<8x128xf32>
    %48 = tpu.matmul %46, %47, %cst_21 {dimension_numbers = #tpu.dot_dimension_numbers<[1], [0], [0], [1], [0, 0, 1, 1], [], []>} : vector<8x32xf32>, vector<32x128xf32>, vector<8x128xf32> -> vector<8x128xf32>
    %49 = arith.addf %48, %9 : vector<8x128xf32>
    %50 = arith.index_cast %15 : i32 to index
    %c0_22 = arith.constant 0 : index
    %51 = vector.load %arg13[%50, %c0_22] : memref<64x128xf32, #tpu.memory_space<vmem>>, vector<8x128xf32>
    tpu.vector_store %arg13[%50, %c0_22], %49 {strides = array<i32>} : memref<64x128xf32, #tpu.memory_space<vmem>>, vector<8x128xf32>,
    %c1_i32 = arith.constant 1 : i32
    %c8_i32_23 = arith.constant 8 : i32
    %52 = arith.muli %c1_i32, %c8_i32_23 : i32
    %53 = tpu.assume_multiple %52, 8 : i32
    %54 = arith.index_cast %53 : i32 to index
    %c0_24 = arith.constant 0 : index
    %55 = vector.load %arg13[%54, %c0_24] : memref<64x128xf32, #tpu.memory_space<vmem>>, vector<8x128xf32>
    %c0_25 = arith.constant 0 : index
    %c0_26 = arith.constant 0 : index
    %56 = vector.load %arg3[%c0_25, %c0_26] : memref<32x128xf32, #tpu.memory_space<vmem>>, vector<32x128xf32>
    %cst_27 = arith.constant dense<0.000000e+00> : vector<8x128xf32>
    %57 = tpu.matmul %46, %56, %cst_27 {dimension_numbers = #tpu.dot_dimension_numbers<[1], [0], [0], [1], [0, 0, 1, 1], [], []>} : vector<8x32xf32>, vector<32x128xf32>, vector<8x128xf32> -> vector<8x128xf32>
    %58 = arith.addf %57, %12 : vector<8x128xf32>
    %59 = vector.extract_strided_slice %55 {offsets = [0, 0], sizes = [8, 32], strides = [1, 1]} : vector<8x128xf32> to vector<8x32xf32>
    %60 = vector.extract_strided_slice %55 {offsets = [0, 32], sizes = [8, 32], strides = [1, 1]} : vector<8x128xf32> to vector<8x32xf32>
    %61 = vector.extract_strided_slice %55 {offsets = [0, 64], sizes = [8, 32], strides = [1, 1]} : vector<8x128xf32> to vector<8x32xf32>
    %62 = vector.extract_strided_slice %58 {offsets = [0, 0], sizes = [8, 32], strides = [1, 1]} : vector<8x128xf32> to vector<8x32xf32>
    %63 = vector.extract_strided_slice %58 {offsets = [0, 32], sizes = [8, 32], strides = [1, 1]} : vector<8x128xf32> to vector<8x32xf32>
    %64 = vector.extract_strided_slice %58 {offsets = [0, 64], sizes = [8, 32], strides = [1, 1]} : vector<8x128xf32> to vector<8x32xf32>
    %65 = arith.addf %59, %62 : vector<8x32xf32>
    %66 = arith.negf %65 : vector<8x32xf32>
    %67 = math.exp %66 : vector<8x32xf32>
    %cst_28 = arith.constant 1.000000e+00 : f32
    %68 = vector.broadcast %cst_28 : f32 to vector<8x32xf32>
    %69 = arith.addf %68, %67 : vector<8x32xf32>
    %70 = arith.divf %68, %69 : vector<8x32xf32>
    %71 = arith.addf %60, %63 : vector<8x32xf32>
    %72 = arith.negf %71 : vector<8x32xf32>
    %73 = math.exp %72 : vector<8x32xf32>
    %cst_29 = arith.constant 1.000000e+00 : f32
    %74 = vector.broadcast %cst_29 : f32 to vector<8x32xf32>
    %75 = arith.addf %74, %73 : vector<8x32xf32>
    %76 = arith.divf %74, %75 : vector<8x32xf32>
    %77 = arith.mulf %70, %64 : vector<8x32xf32>
    %78 = arith.addf %61, %77 : vector<8x32xf32>
    %79 = math.tanh %78 : vector<8x32xf32>
    %cst_30 = arith.constant 1.000000e+00 : f32
    %80 = vector.broadcast %cst_30 : f32 to vector<8x32xf32>
    %81 = arith.subf %80, %76 : vector<8x32xf32>
    %82 = arith.mulf %81, %79 : vector<8x32xf32>
    %83 = arith.mulf %76, %46 : vector<8x32xf32>
    %84 = arith.addf %82, %83 : vector<8x32xf32>
    %c0_31 = arith.constant 0 : index
    %c0_32 = arith.constant 0 : index
    %85 = vector.load %arg6[%c0_31, %c0_32] : memref<32x128xf32, #tpu.memory_space<vmem>>, vector<32x128xf32>
    %cst_33 = arith.constant dense<0.000000e+00> : vector<8x128xf32>
    %86 = tpu.matmul %84, %85, %cst_33 {dimension_numbers = #tpu.dot_dimension_numbers<[1], [0], [0], [1], [0, 0, 1, 1], [], []>} : vector<8x32xf32>, vector<32x128xf32>, vector<8x128xf32> -> vector<8x128xf32>
    %87 = arith.addf %86, %9 : vector<8x128xf32>
    %88 = arith.index_cast %53 : i32 to index
    %c0_34 = arith.constant 0 : index
    %89 = vector.load %arg13[%88, %c0_34] : memref<64x128xf32, #tpu.memory_space<vmem>>, vector<8x128xf32>
    tpu.vector_store %arg13[%88, %c0_34], %87 {strides = array<i32>} : memref<64x128xf32, #tpu.memory_space<vmem>>, vector<8x128xf32>,
    %c2_i32 = arith.constant 2 : i32
    %c8_i32_35 = arith.constant 8 : i32
    %90 = arith.muli %c2_i32, %c8_i32_35 : i32
    %91 = tpu.assume_multiple %90, 8 : i32
    %92 = arith.index_cast %91 : i32 to index
    %c0_36 = arith.constant 0 : index
    %93 = vector.load %arg13[%92, %c0_36] : memref<64x128xf32, #tpu.memory_space<vmem>>, vector<8x128xf32>
    %c0_37 = arith.constant 0 : index
    %c0_38 = arith.constant 0 : index
    %94 = vector.load %arg3[%c0_37, %c0_38] : memref<32x128xf32, #tpu.memory_space<vmem>>, vector<32x128xf32>
    %cst_39 = arith.constant dense<0.000000e+00> : vector<8x128xf32>
    %95 = tpu.matmul %84, %94, %cst_39 {dimension_numbers = #tpu.dot_dimension_numbers<[1], [0], [0], [1], [0, 0, 1, 1], [], []>} : vector<8x32xf32>, vector<32x128xf32>, vector<8x128xf32> -> vector<8x128xf32>
    %96 = arith.addf %95, %12 : vector<8x128xf32>
    %97 = vector.extract_strided_slice %93 {offsets = [0, 0], sizes = [8, 32], strides = [1, 1]} : vector<8x128xf32> to vector<8x32xf32>
    %98 = vector.extract_strided_slice %93 {offsets = [0, 32], sizes = [8, 32], strides = [1, 1]} : vector<8x128xf32> to vector<8x32xf32>
    %99 = vector.extract_strided_slice %93 {offsets = [0, 64], sizes = [8, 32], strides = [1, 1]} : vector<8x128xf32> to vector<8x32xf32>
    %100 = vector.extract_strided_slice %96 {offsets = [0, 0], sizes = [8, 32], strides = [1, 1]} : vector<8x128xf32> to vector<8x32xf32>
    %101 = vector.extract_strided_slice %96 {offsets = [0, 32], sizes = [8, 32], strides = [1, 1]} : vector<8x128xf32> to vector<8x32xf32>
    %102 = vector.extract_strided_slice %96 {offsets = [0, 64], sizes = [8, 32], strides = [1, 1]} : vector<8x128xf32> to vector<8x32xf32>
    %103 = arith.addf %97, %100 : vector<8x32xf32>
    %104 = arith.negf %103 : vector<8x32xf32>
    %105 = math.exp %104 : vector<8x32xf32>
    %cst_40 = arith.constant 1.000000e+00 : f32
    %106 = vector.broadcast %cst_40 : f32 to vector<8x32xf32>
    %107 = arith.addf %106, %105 : vector<8x32xf32>
    %108 = arith.divf %106, %107 : vector<8x32xf32>
    %109 = arith.addf %98, %101 : vector<8x32xf32>
    %110 = arith.negf %109 : vector<8x32xf32>
    %111 = math.exp %110 : vector<8x32xf32>
    %cst_41 = arith.constant 1.000000e+00 : f32
    %112 = vector.broadcast %cst_41 : f32 to vector<8x32xf32>
    %113 = arith.addf %112, %111 : vector<8x32xf32>
    %114 = arith.divf %112, %113 : vector<8x32xf32>
    %115 = arith.mulf %108, %102 : vector<8x32xf32>
    %116 = arith.addf %99, %115 : vector<8x32xf32>
    %117 = math.tanh %116 : vector<8x32xf32>
    %cst_42 = arith.constant 1.000000e+00 : f32
    %118 = vector.broadcast %cst_42 : f32 to vector<8x32xf32>
    %119 = arith.subf %118, %114 : vector<8x32xf32>
    %120 = arith.mulf %119, %117 : vector<8x32xf32>
    %121 = arith.mulf %114, %84 : vector<8x32xf32>
    %122 = arith.addf %120, %121 : vector<8x32xf32>
    %c0_43 = arith.constant 0 : index
    %c0_44 = arith.constant 0 : index
    %123 = vector.load %arg6[%c0_43, %c0_44] : memref<32x128xf32, #tpu.memory_space<vmem>>, vector<32x128xf32>
    %cst_45 = arith.constant dense<0.000000e+00> : vector<8x128xf32>
    %124 = tpu.matmul %122, %123, %cst_45 {dimension_numbers = #tpu.dot_dimension_numbers<[1], [0], [0], [1], [0, 0, 1, 1], [], []>} : vector<8x32xf32>, vector<32x128xf32>, vector<8x128xf32> -> vector<8x128xf32>
    %125 = arith.addf %124, %9 : vector<8x128xf32>
    %126 = arith.index_cast %91 : i32 to index
    %c0_46 = arith.constant 0 : index
    %127 = vector.load %arg13[%126, %c0_46] : memref<64x128xf32, #tpu.memory_space<vmem>>, vector<8x128xf32>
    tpu.vector_store %arg13[%126, %c0_46], %125 {strides = array<i32>} : memref<64x128xf32, #tpu.memory_space<vmem>>, vector<8x128xf32>,
    %c3_i32 = arith.constant 3 : i32
    %c8_i32_47 = arith.constant 8 : i32
    %128 = arith.muli %c3_i32, %c8_i32_47 : i32
    %129 = tpu.assume_multiple %128, 8 : i32
    %130 = arith.index_cast %129 : i32 to index
    %c0_48 = arith.constant 0 : index
    %131 = vector.load %arg13[%130, %c0_48] : memref<64x128xf32, #tpu.memory_space<vmem>>, vector<8x128xf32>
    %c0_49 = arith.constant 0 : index
    %c0_50 = arith.constant 0 : index
    %132 = vector.load %arg3[%c0_49, %c0_50] : memref<32x128xf32, #tpu.memory_space<vmem>>, vector<32x128xf32>
    %cst_51 = arith.constant dense<0.000000e+00> : vector<8x128xf32>
    %133 = tpu.matmul %122, %132, %cst_51 {dimension_numbers = #tpu.dot_dimension_numbers<[1], [0], [0], [1], [0, 0, 1, 1], [], []>} : vector<8x32xf32>, vector<32x128xf32>, vector<8x128xf32> -> vector<8x128xf32>
    %134 = arith.addf %133, %12 : vector<8x128xf32>
    %135 = vector.extract_strided_slice %131 {offsets = [0, 0], sizes = [8, 32], strides = [1, 1]} : vector<8x128xf32> to vector<8x32xf32>
    %136 = vector.extract_strided_slice %131 {offsets = [0, 32], sizes = [8, 32], strides = [1, 1]} : vector<8x128xf32> to vector<8x32xf32>
    %137 = vector.extract_strided_slice %131 {offsets = [0, 64], sizes = [8, 32], strides = [1, 1]} : vector<8x128xf32> to vector<8x32xf32>
    %138 = vector.extract_strided_slice %134 {offsets = [0, 0], sizes = [8, 32], strides = [1, 1]} : vector<8x128xf32> to vector<8x32xf32>
    %139 = vector.extract_strided_slice %134 {offsets = [0, 32], sizes = [8, 32], strides = [1, 1]} : vector<8x128xf32> to vector<8x32xf32>
    %140 = vector.extract_strided_slice %134 {offsets = [0, 64], sizes = [8, 32], strides = [1, 1]} : vector<8x128xf32> to vector<8x32xf32>
    %141 = arith.addf %135, %138 : vector<8x32xf32>
    %142 = arith.negf %141 : vector<8x32xf32>
    %143 = math.exp %142 : vector<8x32xf32>
    %cst_52 = arith.constant 1.000000e+00 : f32
    %144 = vector.broadcast %cst_52 : f32 to vector<8x32xf32>
    %145 = arith.addf %144, %143 : vector<8x32xf32>
    %146 = arith.divf %144, %145 : vector<8x32xf32>
    %147 = arith.addf %136, %139 : vector<8x32xf32>
    %148 = arith.negf %147 : vector<8x32xf32>
    %149 = math.exp %148 : vector<8x32xf32>
    %cst_53 = arith.constant 1.000000e+00 : f32
    %150 = vector.broadcast %cst_53 : f32 to vector<8x32xf32>
    %151 = arith.addf %150, %149 : vector<8x32xf32>
    %152 = arith.divf %150, %151 : vector<8x32xf32>
    %153 = arith.mulf %146, %140 : vector<8x32xf32>
    %154 = arith.addf %137, %153 : vector<8x32xf32>
    %155 = math.tanh %154 : vector<8x32xf32>
    %cst_54 = arith.constant 1.000000e+00 : f32
    %156 = vector.broadcast %cst_54 : f32 to vector<8x32xf32>
    %157 = arith.subf %156, %152 : vector<8x32xf32>
    %158 = arith.mulf %157, %155 : vector<8x32xf32>
    %159 = arith.mulf %152, %122 : vector<8x32xf32>
    %160 = arith.addf %158, %159 : vector<8x32xf32>
    %c0_55 = arith.constant 0 : index
    %c0_56 = arith.constant 0 : index
    %161 = vector.load %arg6[%c0_55, %c0_56] : memref<32x128xf32, #tpu.memory_space<vmem>>, vector<32x128xf32>
    %cst_57 = arith.constant dense<0.000000e+00> : vector<8x128xf32>
    %162 = tpu.matmul %160, %161, %cst_57 {dimension_numbers = #tpu.dot_dimension_numbers<[1], [0], [0], [1], [0, 0, 1, 1], [], []>} : vector<8x32xf32>, vector<32x128xf32>, vector<8x128xf32> -> vector<8x128xf32>
    %163 = arith.addf %162, %9 : vector<8x128xf32>
    %164 = arith.index_cast %129 : i32 to index
    %c0_58 = arith.constant 0 : index
    %165 = vector.load %arg13[%164, %c0_58] : memref<64x128xf32, #tpu.memory_space<vmem>>, vector<8x128xf32>
    tpu.vector_store %arg13[%164, %c0_58], %163 {strides = array<i32>} : memref<64x128xf32, #tpu.memory_space<vmem>>, vector<8x128xf32>,
    %c4_i32 = arith.constant 4 : i32
    %c8_i32_59 = arith.constant 8 : i32
    %166 = arith.muli %c4_i32, %c8_i32_59 : i32
    %167 = tpu.assume_multiple %166, 8 : i32
    %168 = arith.index_cast %167 : i32 to index
    %c0_60 = arith.constant 0 : index
    %169 = vector.load %arg13[%168, %c0_60] : memref<64x128xf32, #tpu.memory_space<vmem>>, vector<8x128xf32>
    %c0_61 = arith.constant 0 : index
    %c0_62 = arith.constant 0 : index
    %170 = vector.load %arg3[%c0_61, %c0_62] : memref<32x128xf32, #tpu.memory_space<vmem>>, vector<32x128xf32>
    %cst_63 = arith.constant dense<0.000000e+00> : vector<8x128xf32>
    %171 = tpu.matmul %160, %170, %cst_63 {dimension_numbers = #tpu.dot_dimension_numbers<[1], [0], [0], [1], [0, 0, 1, 1], [], []>} : vector<8x32xf32>, vector<32x128xf32>, vector<8x128xf32> -> vector<8x128xf32>
    %172 = arith.addf %171, %12 : vector<8x128xf32>
    %173 = vector.extract_strided_slice %169 {offsets = [0, 0], sizes = [8, 32], strides = [1, 1]} : vector<8x128xf32> to vector<8x32xf32>
    %174 = vector.extract_strided_slice %169 {offsets = [0, 32], sizes = [8, 32], strides = [1, 1]} : vector<8x128xf32> to vector<8x32xf32>
    %175 = vector.extract_strided_slice %169 {offsets = [0, 64], sizes = [8, 32], strides = [1, 1]} : vector<8x128xf32> to vector<8x32xf32>
    %176 = vector.extract_strided_slice %172 {offsets = [0, 0], sizes = [8, 32], strides = [1, 1]} : vector<8x128xf32> to vector<8x32xf32>
    %177 = vector.extract_strided_slice %172 {offsets = [0, 32], sizes = [8, 32], strides = [1, 1]} : vector<8x128xf32> to vector<8x32xf32>
    %178 = vector.extract_strided_slice %172 {offsets = [0, 64], sizes = [8, 32], strides = [1, 1]} : vector<8x128xf32> to vector<8x32xf32>
    %179 = arith.addf %173, %176 : vector<8x32xf32>
    %180 = arith.negf %179 : vector<8x32xf32>
    %181 = math.exp %180 : vector<8x32xf32>
    %cst_64 = arith.constant 1.000000e+00 : f32
    %182 = vector.broadcast %cst_64 : f32 to vector<8x32xf32>
    %183 = arith.addf %182, %181 : vector<8x32xf32>
    %184 = arith.divf %182, %183 : vector<8x32xf32>
    %185 = arith.addf %174, %177 : vector<8x32xf32>
    %186 = arith.negf %185 : vector<8x32xf32>
    %187 = math.exp %186 : vector<8x32xf32>
    %cst_65 = arith.constant 1.000000e+00 : f32
    %188 = vector.broadcast %cst_65 : f32 to vector<8x32xf32>
    %189 = arith.addf %188, %187 : vector<8x32xf32>
    %190 = arith.divf %188, %189 : vector<8x32xf32>
    %191 = arith.mulf %184, %178 : vector<8x32xf32>
    %192 = arith.addf %175, %191 : vector<8x32xf32>
    %193 = math.tanh %192 : vector<8x32xf32>
    %cst_66 = arith.constant 1.000000e+00 : f32
    %194 = vector.broadcast %cst_66 : f32 to vector<8x32xf32>
    %195 = arith.subf %194, %190 : vector<8x32xf32>
    %196 = arith.mulf %195, %193 : vector<8x32xf32>
    %197 = arith.mulf %190, %160 : vector<8x32xf32>
    %198 = arith.addf %196, %197 : vector<8x32xf32>
    %c0_67 = arith.constant 0 : index
    %c0_68 = arith.constant 0 : index
    %199 = vector.load %arg6[%c0_67, %c0_68] : memref<32x128xf32, #tpu.memory_space<vmem>>, vector<32x128xf32>
    %cst_69 = arith.constant dense<0.000000e+00> : vector<8x128xf32>
    %200 = tpu.matmul %198, %199, %cst_69 {dimension_numbers = #tpu.dot_dimension_numbers<[1], [0], [0], [1], [0, 0, 1, 1], [], []>} : vector<8x32xf32>, vector<32x128xf32>, vector<8x128xf32> -> vector<8x128xf32>
    %201 = arith.addf %200, %9 : vector<8x128xf32>
    %202 = arith.index_cast %167 : i32 to index
    %c0_70 = arith.constant 0 : index
    %203 = vector.load %arg13[%202, %c0_70] : memref<64x128xf32, #tpu.memory_space<vmem>>, vector<8x128xf32>
    tpu.vector_store %arg13[%202, %c0_70], %201 {strides = array<i32>} : memref<64x128xf32, #tpu.memory_space<vmem>>, vector<8x128xf32>,
    %c5_i32 = arith.constant 5 : i32
    %c8_i32_71 = arith.constant 8 : i32
    %204 = arith.muli %c5_i32, %c8_i32_71 : i32
    %205 = tpu.assume_multiple %204, 8 : i32
    %206 = arith.index_cast %205 : i32 to index
    %c0_72 = arith.constant 0 : index
    %207 = vector.load %arg13[%206, %c0_72] : memref<64x128xf32, #tpu.memory_space<vmem>>, vector<8x128xf32>
    %c0_73 = arith.constant 0 : index
    %c0_74 = arith.constant 0 : index
    %208 = vector.load %arg3[%c0_73, %c0_74] : memref<32x128xf32, #tpu.memory_space<vmem>>, vector<32x128xf32>
    %cst_75 = arith.constant dense<0.000000e+00> : vector<8x128xf32>
    %209 = tpu.matmul %198, %208, %cst_75 {dimension_numbers = #tpu.dot_dimension_numbers<[1], [0], [0], [1], [0, 0, 1, 1], [], []>} : vector<8x32xf32>, vector<32x128xf32>, vector<8x128xf32> -> vector<8x128xf32>
    %210 = arith.addf %209, %12 : vector<8x128xf32>
    %211 = vector.extract_strided_slice %207 {offsets = [0, 0], sizes = [8, 32], strides = [1, 1]} : vector<8x128xf32> to vector<8x32xf32>
    %212 = vector.extract_strided_slice %207 {offsets = [0, 32], sizes = [8, 32], strides = [1, 1]} : vector<8x128xf32> to vector<8x32xf32>
    %213 = vector.extract_strided_slice %207 {offsets = [0, 64], sizes = [8, 32], strides = [1, 1]} : vector<8x128xf32> to vector<8x32xf32>
    %214 = vector.extract_strided_slice %210 {offsets = [0, 0], sizes = [8, 32], strides = [1, 1]} : vector<8x128xf32> to vector<8x32xf32>
    %215 = vector.extract_strided_slice %210 {offsets = [0, 32], sizes = [8, 32], strides = [1, 1]} : vector<8x128xf32> to vector<8x32xf32>
    %216 = vector.extract_strided_slice %210 {offsets = [0, 64], sizes = [8, 32], strides = [1, 1]} : vector<8x128xf32> to vector<8x32xf32>
    %217 = arith.addf %211, %214 : vector<8x32xf32>
    %218 = arith.negf %217 : vector<8x32xf32>
    %219 = math.exp %218 : vector<8x32xf32>
    %cst_76 = arith.constant 1.000000e+00 : f32
    %220 = vector.broadcast %cst_76 : f32 to vector<8x32xf32>
    %221 = arith.addf %220, %219 : vector<8x32xf32>
    %222 = arith.divf %220, %221 : vector<8x32xf32>
    %223 = arith.addf %212, %215 : vector<8x32xf32>
    %224 = arith.negf %223 : vector<8x32xf32>
    %225 = math.exp %224 : vector<8x32xf32>
    %cst_77 = arith.constant 1.000000e+00 : f32
    %226 = vector.broadcast %cst_77 : f32 to vector<8x32xf32>
    %227 = arith.addf %226, %225 : vector<8x32xf32>
    %228 = arith.divf %226, %227 : vector<8x32xf32>
    %229 = arith.mulf %222, %216 : vector<8x32xf32>
    %230 = arith.addf %213, %229 : vector<8x32xf32>
    %231 = math.tanh %230 : vector<8x32xf32>
    %cst_78 = arith.constant 1.000000e+00 : f32
    %232 = vector.broadcast %cst_78 : f32 to vector<8x32xf32>
    %233 = arith.subf %232, %228 : vector<8x32xf32>
    %234 = arith.mulf %233, %231 : vector<8x32xf32>
    %235 = arith.mulf %228, %198 : vector<8x32xf32>
    %236 = arith.addf %234, %235 : vector<8x32xf32>
    %c0_79 = arith.constant 0 : index
    %c0_80 = arith.constant 0 : index
    %237 = vector.load %arg6[%c0_79, %c0_80] : memref<32x128xf32, #tpu.memory_space<vmem>>, vector<32x128xf32>
    %cst_81 = arith.constant dense<0.000000e+00> : vector<8x128xf32>
    %238 = tpu.matmul %236, %237, %cst_81 {dimension_numbers = #tpu.dot_dimension_numbers<[1], [0], [0], [1], [0, 0, 1, 1], [], []>} : vector<8x32xf32>, vector<32x128xf32>, vector<8x128xf32> -> vector<8x128xf32>
    %239 = arith.addf %238, %9 : vector<8x128xf32>
    %240 = arith.index_cast %205 : i32 to index
    %c0_82 = arith.constant 0 : index
    %241 = vector.load %arg13[%240, %c0_82] : memref<64x128xf32, #tpu.memory_space<vmem>>, vector<8x128xf32>
    tpu.vector_store %arg13[%240, %c0_82], %239 {strides = array<i32>} : memref<64x128xf32, #tpu.memory_space<vmem>>, vector<8x128xf32>,
    %c6_i32 = arith.constant 6 : i32
    %c8_i32_83 = arith.constant 8 : i32
    %242 = arith.muli %c6_i32, %c8_i32_83 : i32
    %243 = tpu.assume_multiple %242, 8 : i32
    %244 = arith.index_cast %243 : i32 to index
    %c0_84 = arith.constant 0 : index
    %245 = vector.load %arg13[%244, %c0_84] : memref<64x128xf32, #tpu.memory_space<vmem>>, vector<8x128xf32>
    %c0_85 = arith.constant 0 : index
    %c0_86 = arith.constant 0 : index
    %246 = vector.load %arg3[%c0_85, %c0_86] : memref<32x128xf32, #tpu.memory_space<vmem>>, vector<32x128xf32>
    %cst_87 = arith.constant dense<0.000000e+00> : vector<8x128xf32>
    %247 = tpu.matmul %236, %246, %cst_87 {dimension_numbers = #tpu.dot_dimension_numbers<[1], [0], [0], [1], [0, 0, 1, 1], [], []>} : vector<8x32xf32>, vector<32x128xf32>, vector<8x128xf32> -> vector<8x128xf32>
    %248 = arith.addf %247, %12 : vector<8x128xf32>
    %249 = vector.extract_strided_slice %245 {offsets = [0, 0], sizes = [8, 32], strides = [1, 1]} : vector<8x128xf32> to vector<8x32xf32>
    %250 = vector.extract_strided_slice %245 {offsets = [0, 32], sizes = [8, 32], strides = [1, 1]} : vector<8x128xf32> to vector<8x32xf32>
    %251 = vector.extract_strided_slice %245 {offsets = [0, 64], sizes = [8, 32], strides = [1, 1]} : vector<8x128xf32> to vector<8x32xf32>
    %252 = vector.extract_strided_slice %248 {offsets = [0, 0], sizes = [8, 32], strides = [1, 1]} : vector<8x128xf32> to vector<8x32xf32>
    %253 = vector.extract_strided_slice %248 {offsets = [0, 32], sizes = [8, 32], strides = [1, 1]} : vector<8x128xf32> to vector<8x32xf32>
    %254 = vector.extract_strided_slice %248 {offsets = [0, 64], sizes = [8, 32], strides = [1, 1]} : vector<8x128xf32> to vector<8x32xf32>
    %255 = arith.addf %249, %252 : vector<8x32xf32>
    %256 = arith.negf %255 : vector<8x32xf32>
    %257 = math.exp %256 : vector<8x32xf32>
    %cst_88 = arith.constant 1.000000e+00 : f32
    %258 = vector.broadcast %cst_88 : f32 to vector<8x32xf32>
    %259 = arith.addf %258, %257 : vector<8x32xf32>
    %260 = arith.divf %258, %259 : vector<8x32xf32>
    %261 = arith.addf %250, %253 : vector<8x32xf32>
    %262 = arith.negf %261 : vector<8x32xf32>
    %263 = math.exp %262 : vector<8x32xf32>
    %cst_89 = arith.constant 1.000000e+00 : f32
    %264 = vector.broadcast %cst_89 : f32 to vector<8x32xf32>
    %265 = arith.addf %264, %263 : vector<8x32xf32>
    %266 = arith.divf %264, %265 : vector<8x32xf32>
    %267 = arith.mulf %260, %254 : vector<8x32xf32>
    %268 = arith.addf %251, %267 : vector<8x32xf32>
    %269 = math.tanh %268 : vector<8x32xf32>
    %cst_90 = arith.constant 1.000000e+00 : f32
    %270 = vector.broadcast %cst_90 : f32 to vector<8x32xf32>
    %271 = arith.subf %270, %266 : vector<8x32xf32>
    %272 = arith.mulf %271, %269 : vector<8x32xf32>
    %273 = arith.mulf %266, %236 : vector<8x32xf32>
    %274 = arith.addf %272, %273 : vector<8x32xf32>
    %c0_91 = arith.constant 0 : index
    %c0_92 = arith.constant 0 : index
    %275 = vector.load %arg6[%c0_91, %c0_92] : memref<32x128xf32, #tpu.memory_space<vmem>>, vector<32x128xf32>
    %cst_93 = arith.constant dense<0.000000e+00> : vector<8x128xf32>
    %276 = tpu.matmul %274, %275, %cst_93 {dimension_numbers = #tpu.dot_dimension_numbers<[1], [0], [0], [1], [0, 0, 1, 1], [], []>} : vector<8x32xf32>, vector<32x128xf32>, vector<8x128xf32> -> vector<8x128xf32>
    %277 = arith.addf %276, %9 : vector<8x128xf32>
    %278 = arith.index_cast %243 : i32 to index
    %c0_94 = arith.constant 0 : index
    %279 = vector.load %arg13[%278, %c0_94] : memref<64x128xf32, #tpu.memory_space<vmem>>, vector<8x128xf32>
    tpu.vector_store %arg13[%278, %c0_94], %277 {strides = array<i32>} : memref<64x128xf32, #tpu.memory_space<vmem>>, vector<8x128xf32>,
    %c7_i32 = arith.constant 7 : i32
    %c8_i32_95 = arith.constant 8 : i32
    %280 = arith.muli %c7_i32, %c8_i32_95 : i32
    %281 = tpu.assume_multiple %280, 8 : i32
    %282 = arith.index_cast %281 : i32 to index
    %c0_96 = arith.constant 0 : index
    %283 = vector.load %arg13[%282, %c0_96] : memref<64x128xf32, #tpu.memory_space<vmem>>, vector<8x128xf32>
    %c0_97 = arith.constant 0 : index
    %c0_98 = arith.constant 0 : index
    %284 = vector.load %arg3[%c0_97, %c0_98] : memref<32x128xf32, #tpu.memory_space<vmem>>, vector<32x128xf32>
    %cst_99 = arith.constant dense<0.000000e+00> : vector<8x128xf32>
    %285 = tpu.matmul %274, %284, %cst_99 {dimension_numbers = #tpu.dot_dimension_numbers<[1], [0], [0], [1], [0, 0, 1, 1], [], []>} : vector<8x32xf32>, vector<32x128xf32>, vector<8x128xf32> -> vector<8x128xf32>
    %286 = arith.addf %285, %12 : vector<8x128xf32>
    %287 = vector.extract_strided_slice %283 {offsets = [0, 0], sizes = [8, 32], strides = [1, 1]} : vector<8x128xf32> to vector<8x32xf32>
    %288 = vector.extract_strided_slice %283 {offsets = [0, 32], sizes = [8, 32], strides = [1, 1]} : vector<8x128xf32> to vector<8x32xf32>
    %289 = vector.extract_strided_slice %283 {offsets = [0, 64], sizes = [8, 32], strides = [1, 1]} : vector<8x128xf32> to vector<8x32xf32>
    %290 = vector.extract_strided_slice %286 {offsets = [0, 0], sizes = [8, 32], strides = [1, 1]} : vector<8x128xf32> to vector<8x32xf32>
    %291 = vector.extract_strided_slice %286 {offsets = [0, 32], sizes = [8, 32], strides = [1, 1]} : vector<8x128xf32> to vector<8x32xf32>
    %292 = vector.extract_strided_slice %286 {offsets = [0, 64], sizes = [8, 32], strides = [1, 1]} : vector<8x128xf32> to vector<8x32xf32>
    %293 = arith.addf %287, %290 : vector<8x32xf32>
    %294 = arith.negf %293 : vector<8x32xf32>
    %295 = math.exp %294 : vector<8x32xf32>
    %cst_100 = arith.constant 1.000000e+00 : f32
    %296 = vector.broadcast %cst_100 : f32 to vector<8x32xf32>
    %297 = arith.addf %296, %295 : vector<8x32xf32>
    %298 = arith.divf %296, %297 : vector<8x32xf32>
    %299 = arith.addf %288, %291 : vector<8x32xf32>
    %300 = arith.negf %299 : vector<8x32xf32>
    %301 = math.exp %300 : vector<8x32xf32>
    %cst_101 = arith.constant 1.000000e+00 : f32
    %302 = vector.broadcast %cst_101 : f32 to vector<8x32xf32>
    %303 = arith.addf %302, %301 : vector<8x32xf32>
    %304 = arith.divf %302, %303 : vector<8x32xf32>
    %305 = arith.mulf %298, %292 : vector<8x32xf32>
    %306 = arith.addf %289, %305 : vector<8x32xf32>
    %307 = math.tanh %306 : vector<8x32xf32>
    %cst_102 = arith.constant 1.000000e+00 : f32
    %308 = vector.broadcast %cst_102 : f32 to vector<8x32xf32>
    %309 = arith.subf %308, %304 : vector<8x32xf32>
    %310 = arith.mulf %309, %307 : vector<8x32xf32>
    %311 = arith.mulf %304, %274 : vector<8x32xf32>
    %312 = arith.addf %310, %311 : vector<8x32xf32>
    %c0_103 = arith.constant 0 : index
    %c0_104 = arith.constant 0 : index
    %313 = vector.load %arg6[%c0_103, %c0_104] : memref<32x128xf32, #tpu.memory_space<vmem>>, vector<32x128xf32>
    %cst_105 = arith.constant dense<0.000000e+00> : vector<8x128xf32>
    %314 = tpu.matmul %312, %313, %cst_105 {dimension_numbers = #tpu.dot_dimension_numbers<[1], [0], [0], [1], [0, 0, 1, 1], [], []>} : vector<8x32xf32>, vector<32x128xf32>, vector<8x128xf32> -> vector<8x128xf32>
    %315 = arith.addf %314, %9 : vector<8x128xf32>
    %316 = arith.index_cast %281 : i32 to index
    %c0_106 = arith.constant 0 : index
    %317 = vector.load %arg13[%316, %c0_106] : memref<64x128xf32, #tpu.memory_space<vmem>>, vector<8x128xf32>
    tpu.vector_store %arg13[%316, %c0_106], %315 {strides = array<i32>} : memref<64x128xf32, #tpu.memory_space<vmem>>, vector<8x128xf32>,
    %c8_i32_107 = arith.constant 8 : i32
    %c0_108 = arith.constant 0 : index
    %c0_109 = arith.constant 0 : index
    %318 = vector.load %arg9[%c0_108, %c0_109] : memref<1x128xf32, #tpu.memory_space<vmem>>, vector<1x128xf32>
    %319 = vector.shape_cast %318 : vector<1x128xf32> to vector<1x128xf32>
    %320 = vector.broadcast %319 : vector<1x128xf32> to vector<8x128xf32>
    %cst_110 = arith.constant 0.000000e+00 : f32
    %321 = vector.broadcast %cst_110 : f32 to vector<8x32xf32>
    %c0_i32_111 = arith.constant 0 : i32
    %c8_i32_112 = arith.constant 8 : i32
    %322 = arith.muli %c0_i32_111, %c8_i32_112 : i32
    %323 = tpu.assume_multiple %322, 8 : i32
    %324 = arith.index_cast %323 : i32 to index
    %c0_113 = arith.constant 0 : index
    %325 = vector.load %arg13[%324, %c0_113] : memref<64x128xf32, #tpu.memory_space<vmem>>, vector<8x128xf32>
    %c0_114 = arith.constant 0 : index
    %c0_115 = arith.constant 0 : index
    %326 = vector.load %arg7[%c0_114, %c0_115] : memref<32x128xf32, #tpu.memory_space<vmem>>, vector<32x128xf32>
    %cst_116 = arith.constant dense<0.000000e+00> : vector<8x128xf32>
    %327 = tpu.matmul %321, %326, %cst_116 {dimension_numbers = #tpu.dot_dimension_numbers<[1], [0], [0], [1], [0, 0, 1, 1], [], []>} : vector<8x32xf32>, vector<32x128xf32>, vector<8x128xf32> -> vector<8x128xf32>
    %328 = arith.addf %327, %320 : vector<8x128xf32>
    %329 = vector.extract_strided_slice %325 {offsets = [0, 0], sizes = [8, 32], strides = [1, 1]} : vector<8x128xf32> to vector<8x32xf32>
    %330 = vector.extract_strided_slice %325 {offsets = [0, 32], sizes = [8, 32], strides = [1, 1]} : vector<8x128xf32> to vector<8x32xf32>
    %331 = vector.extract_strided_slice %325 {offsets = [0, 64], sizes = [8, 32], strides = [1, 1]} : vector<8x128xf32> to vector<8x32xf32>
    %332 = vector.extract_strided_slice %328 {offsets = [0, 0], sizes = [8, 32], strides = [1, 1]} : vector<8x128xf32> to vector<8x32xf32>
    %333 = vector.extract_strided_slice %328 {offsets = [0, 32], sizes = [8, 32], strides = [1, 1]} : vector<8x128xf32> to vector<8x32xf32>
    %334 = vector.extract_strided_slice %328 {offsets = [0, 64], sizes = [8, 32], strides = [1, 1]} : vector<8x128xf32> to vector<8x32xf32>
    %335 = arith.addf %329, %332 : vector<8x32xf32>
    %336 = arith.negf %335 : vector<8x32xf32>
    %337 = math.exp %336 : vector<8x32xf32>
    %cst_117 = arith.constant 1.000000e+00 : f32
    %338 = vector.broadcast %cst_117 : f32 to vector<8x32xf32>
    %339 = arith.addf %338, %337 : vector<8x32xf32>
    %340 = arith.divf %338, %339 : vector<8x32xf32>
    %341 = arith.addf %330, %333 : vector<8x32xf32>
    %342 = arith.negf %341 : vector<8x32xf32>
    %343 = math.exp %342 : vector<8x32xf32>
    %cst_118 = arith.constant 1.000000e+00 : f32
    %344 = vector.broadcast %cst_118 : f32 to vector<8x32xf32>
    %345 = arith.addf %344, %343 : vector<8x32xf32>
    %346 = arith.divf %344, %345 : vector<8x32xf32>
    %347 = arith.mulf %340, %334 : vector<8x32xf32>
    %348 = arith.addf %331, %347 : vector<8x32xf32>
    %349 = math.tanh %348 : vector<8x32xf32>
    %cst_119 = arith.constant 1.000000e+00 : f32
    %350 = vector.broadcast %cst_119 : f32 to vector<8x32xf32>
    %351 = arith.subf %350, %346 : vector<8x32xf32>
    %352 = arith.mulf %351, %349 : vector<8x32xf32>
    %353 = arith.mulf %346, %321 : vector<8x32xf32>
    %354 = arith.addf %352, %353 : vector<8x32xf32>
    %c1_i32_120 = arith.constant 1 : i32
    %c8_i32_121 = arith.constant 8 : i32
    %355 = arith.muli %c1_i32_120, %c8_i32_121 : i32
    %356 = tpu.assume_multiple %355, 8 : i32
    %357 = arith.index_cast %356 : i32 to index
    %c0_122 = arith.constant 0 : index
    %358 = vector.load %arg13[%357, %c0_122] : memref<64x128xf32, #tpu.memory_space<vmem>>, vector<8x128xf32>
    %c0_123 = arith.constant 0 : index
    %c0_124 = arith.constant 0 : index
    %359 = vector.load %arg7[%c0_123, %c0_124] : memref<32x128xf32, #tpu.memory_space<vmem>>, vector<32x128xf32>
    %cst_125 = arith.constant dense<0.000000e+00> : vector<8x128xf32>
    %360 = tpu.matmul %354, %359, %cst_125 {dimension_numbers = #tpu.dot_dimension_numbers<[1], [0], [0], [1], [0, 0, 1, 1], [], []>} : vector<8x32xf32>, vector<32x128xf32>, vector<8x128xf32> -> vector<8x128xf32>
    %361 = arith.addf %360, %320 : vector<8x128xf32>
    %362 = vector.extract_strided_slice %358 {offsets = [0, 0], sizes = [8, 32], strides = [1, 1]} : vector<8x128xf32> to vector<8x32xf32>
    %363 = vector.extract_strided_slice %358 {offsets = [0, 32], sizes = [8, 32], strides = [1, 1]} : vector<8x128xf32> to vector<8x32xf32>
    %364 = vector.extract_strided_slice %358 {offsets = [0, 64], sizes = [8, 32], strides = [1, 1]} : vector<8x128xf32> to vector<8x32xf32>
    %365 = vector.extract_strided_slice %361 {offsets = [0, 0], sizes = [8, 32], strides = [1, 1]} : vector<8x128xf32> to vector<8x32xf32>
    %366 = vector.extract_strided_slice %361 {offsets = [0, 32], sizes = [8, 32], strides = [1, 1]} : vector<8x128xf32> to vector<8x32xf32>
    %367 = vector.extract_strided_slice %361 {offsets = [0, 64], sizes = [8, 32], strides = [1, 1]} : vector<8x128xf32> to vector<8x32xf32>
    %368 = arith.addf %362, %365 : vector<8x32xf32>
    %369 = arith.negf %368 : vector<8x32xf32>
    %370 = math.exp %369 : vector<8x32xf32>
    %cst_126 = arith.constant 1.000000e+00 : f32
    %371 = vector.broadcast %cst_126 : f32 to vector<8x32xf32>
    %372 = arith.addf %371, %370 : vector<8x32xf32>
    %373 = arith.divf %371, %372 : vector<8x32xf32>
    %374 = arith.addf %363, %366 : vector<8x32xf32>
    %375 = arith.negf %374 : vector<8x32xf32>
    %376 = math.exp %375 : vector<8x32xf32>
    %cst_127 = arith.constant 1.000000e+00 : f32
    %377 = vector.broadcast %cst_127 : f32 to vector<8x32xf32>
    %378 = arith.addf %377, %376 : vector<8x32xf32>
    %379 = arith.divf %377, %378 : vector<8x32xf32>
    %380 = arith.mulf %373, %367 : vector<8x32xf32>
    %381 = arith.addf %364, %380 : vector<8x32xf32>
    %382 = math.tanh %381 : vector<8x32xf32>
    %cst_128 = arith.constant 1.000000e+00 : f32
    %383 = vector.broadcast %cst_128 : f32 to vector<8x32xf32>
    %384 = arith.subf %383, %379 : vector<8x32xf32>
    %385 = arith.mulf %384, %382 : vector<8x32xf32>
    %386 = arith.mulf %379, %354 : vector<8x32xf32>
    %387 = arith.addf %385, %386 : vector<8x32xf32>
    %c2_i32_129 = arith.constant 2 : i32
    %c8_i32_130 = arith.constant 8 : i32
    %388 = arith.muli %c2_i32_129, %c8_i32_130 : i32
    %389 = tpu.assume_multiple %388, 8 : i32
    %390 = arith.index_cast %389 : i32 to index
    %c0_131 = arith.constant 0 : index
    %391 = vector.load %arg13[%390, %c0_131] : memref<64x128xf32, #tpu.memory_space<vmem>>, vector<8x128xf32>
    %c0_132 = arith.constant 0 : index
    %c0_133 = arith.constant 0 : index
    %392 = vector.load %arg7[%c0_132, %c0_133] : memref<32x128xf32, #tpu.memory_space<vmem>>, vector<32x128xf32>
    %cst_134 = arith.constant dense<0.000000e+00> : vector<8x128xf32>
    %393 = tpu.matmul %387, %392, %cst_134 {dimension_numbers = #tpu.dot_dimension_numbers<[1], [0], [0], [1], [0, 0, 1, 1], [], []>} : vector<8x32xf32>, vector<32x128xf32>, vector<8x128xf32> -> vector<8x128xf32>
    %394 = arith.addf %393, %320 : vector<8x128xf32>
    %395 = vector.extract_strided_slice %391 {offsets = [0, 0], sizes = [8, 32], strides = [1, 1]} : vector<8x128xf32> to vector<8x32xf32>
    %396 = vector.extract_strided_slice %391 {offsets = [0, 32], sizes = [8, 32], strides = [1, 1]} : vector<8x128xf32> to vector<8x32xf32>
    %397 = vector.extract_strided_slice %391 {offsets = [0, 64], sizes = [8, 32], strides = [1, 1]} : vector<8x128xf32> to vector<8x32xf32>
    %398 = vector.extract_strided_slice %394 {offsets = [0, 0], sizes = [8, 32], strides = [1, 1]} : vector<8x128xf32> to vector<8x32xf32>
    %399 = vector.extract_strided_slice %394 {offsets = [0, 32], sizes = [8, 32], strides = [1, 1]} : vector<8x128xf32> to vector<8x32xf32>
    %400 = vector.extract_strided_slice %394 {offsets = [0, 64], sizes = [8, 32], strides = [1, 1]} : vector<8x128xf32> to vector<8x32xf32>
    %401 = arith.addf %395, %398 : vector<8x32xf32>
    %402 = arith.negf %401 : vector<8x32xf32>
    %403 = math.exp %402 : vector<8x32xf32>
    %cst_135 = arith.constant 1.000000e+00 : f32
    %404 = vector.broadcast %cst_135 : f32 to vector<8x32xf32>
    %405 = arith.addf %404, %403 : vector<8x32xf32>
    %406 = arith.divf %404, %405 : vector<8x32xf32>
    %407 = arith.addf %396, %399 : vector<8x32xf32>
    %408 = arith.negf %407 : vector<8x32xf32>
    %409 = math.exp %408 : vector<8x32xf32>
    %cst_136 = arith.constant 1.000000e+00 : f32
    %410 = vector.broadcast %cst_136 : f32 to vector<8x32xf32>
    %411 = arith.addf %410, %409 : vector<8x32xf32>
    %412 = arith.divf %410, %411 : vector<8x32xf32>
    %413 = arith.mulf %406, %400 : vector<8x32xf32>
    %414 = arith.addf %397, %413 : vector<8x32xf32>
    %415 = math.tanh %414 : vector<8x32xf32>
    %cst_137 = arith.constant 1.000000e+00 : f32
    %416 = vector.broadcast %cst_137 : f32 to vector<8x32xf32>
    %417 = arith.subf %416, %412 : vector<8x32xf32>
    %418 = arith.mulf %417, %415 : vector<8x32xf32>
    %419 = arith.mulf %412, %387 : vector<8x32xf32>
    %420 = arith.addf %418, %419 : vector<8x32xf32>
    %c3_i32_138 = arith.constant 3 : i32
    %c8_i32_139 = arith.constant 8 : i32
    %421 = arith.muli %c3_i32_138, %c8_i32_139 : i32
    %422 = tpu.assume_multiple %421, 8 : i32
    %423 = arith.index_cast %422 : i32 to index
    %c0_140 = arith.constant 0 : index
    %424 = vector.load %arg13[%423, %c0_140] : memref<64x128xf32, #tpu.memory_space<vmem>>, vector<8x128xf32>
    %c0_141 = arith.constant 0 : index
    %c0_142 = arith.constant 0 : index
    %425 = vector.load %arg7[%c0_141, %c0_142] : memref<32x128xf32, #tpu.memory_space<vmem>>, vector<32x128xf32>
    %cst_143 = arith.constant dense<0.000000e+00> : vector<8x128xf32>
    %426 = tpu.matmul %420, %425, %cst_143 {dimension_numbers = #tpu.dot_dimension_numbers<[1], [0], [0], [1], [0, 0, 1, 1], [], []>} : vector<8x32xf32>, vector<32x128xf32>, vector<8x128xf32> -> vector<8x128xf32>
    %427 = arith.addf %426, %320 : vector<8x128xf32>
    %428 = vector.extract_strided_slice %424 {offsets = [0, 0], sizes = [8, 32], strides = [1, 1]} : vector<8x128xf32> to vector<8x32xf32>
    %429 = vector.extract_strided_slice %424 {offsets = [0, 32], sizes = [8, 32], strides = [1, 1]} : vector<8x128xf32> to vector<8x32xf32>
    %430 = vector.extract_strided_slice %424 {offsets = [0, 64], sizes = [8, 32], strides = [1, 1]} : vector<8x128xf32> to vector<8x32xf32>
    %431 = vector.extract_strided_slice %427 {offsets = [0, 0], sizes = [8, 32], strides = [1, 1]} : vector<8x128xf32> to vector<8x32xf32>
    %432 = vector.extract_strided_slice %427 {offsets = [0, 32], sizes = [8, 32], strides = [1, 1]} : vector<8x128xf32> to vector<8x32xf32>
    %433 = vector.extract_strided_slice %427 {offsets = [0, 64], sizes = [8, 32], strides = [1, 1]} : vector<8x128xf32> to vector<8x32xf32>
    %434 = arith.addf %428, %431 : vector<8x32xf32>
    %435 = arith.negf %434 : vector<8x32xf32>
    %436 = math.exp %435 : vector<8x32xf32>
    %cst_144 = arith.constant 1.000000e+00 : f32
    %437 = vector.broadcast %cst_144 : f32 to vector<8x32xf32>
    %438 = arith.addf %437, %436 : vector<8x32xf32>
    %439 = arith.divf %437, %438 : vector<8x32xf32>
    %440 = arith.addf %429, %432 : vector<8x32xf32>
    %441 = arith.negf %440 : vector<8x32xf32>
    %442 = math.exp %441 : vector<8x32xf32>
    %cst_145 = arith.constant 1.000000e+00 : f32
    %443 = vector.broadcast %cst_145 : f32 to vector<8x32xf32>
    %444 = arith.addf %443, %442 : vector<8x32xf32>
    %445 = arith.divf %443, %444 : vector<8x32xf32>
    %446 = arith.mulf %439, %433 : vector<8x32xf32>
    %447 = arith.addf %430, %446 : vector<8x32xf32>
    %448 = math.tanh %447 : vector<8x32xf32>
    %cst_146 = arith.constant 1.000000e+00 : f32
    %449 = vector.broadcast %cst_146 : f32 to vector<8x32xf32>
    %450 = arith.subf %449, %445 : vector<8x32xf32>
    %451 = arith.mulf %450, %448 : vector<8x32xf32>
    %452 = arith.mulf %445, %420 : vector<8x32xf32>
    %453 = arith.addf %451, %452 : vector<8x32xf32>
    %c4_i32_147 = arith.constant 4 : i32
    %c8_i32_148 = arith.constant 8 : i32
    %454 = arith.muli %c4_i32_147, %c8_i32_148 : i32
    %455 = tpu.assume_multiple %454, 8 : i32
    %456 = arith.index_cast %455 : i32 to index
    %c0_149 = arith.constant 0 : index
    %457 = vector.load %arg13[%456, %c0_149] : memref<64x128xf32, #tpu.memory_space<vmem>>, vector<8x128xf32>
    %c0_150 = arith.constant 0 : index
    %c0_151 = arith.constant 0 : index
    %458 = vector.load %arg7[%c0_150, %c0_151] : memref<32x128xf32, #tpu.memory_space<vmem>>, vector<32x128xf32>
    %cst_152 = arith.constant dense<0.000000e+00> : vector<8x128xf32>
    %459 = tpu.matmul %453, %458, %cst_152 {dimension_numbers = #tpu.dot_dimension_numbers<[1], [0], [0], [1], [0, 0, 1, 1], [], []>} : vector<8x32xf32>, vector<32x128xf32>, vector<8x128xf32> -> vector<8x128xf32>
    %460 = arith.addf %459, %320 : vector<8x128xf32>
    %461 = vector.extract_strided_slice %457 {offsets = [0, 0], sizes = [8, 32], strides = [1, 1]} : vector<8x128xf32> to vector<8x32xf32>
    %462 = vector.extract_strided_slice %457 {offsets = [0, 32], sizes = [8, 32], strides = [1, 1]} : vector<8x128xf32> to vector<8x32xf32>
    %463 = vector.extract_strided_slice %457 {offsets = [0, 64], sizes = [8, 32], strides = [1, 1]} : vector<8x128xf32> to vector<8x32xf32>
    %464 = vector.extract_strided_slice %460 {offsets = [0, 0], sizes = [8, 32], strides = [1, 1]} : vector<8x128xf32> to vector<8x32xf32>
    %465 = vector.extract_strided_slice %460 {offsets = [0, 32], sizes = [8, 32], strides = [1, 1]} : vector<8x128xf32> to vector<8x32xf32>
    %466 = vector.extract_strided_slice %460 {offsets = [0, 64], sizes = [8, 32], strides = [1, 1]} : vector<8x128xf32> to vector<8x32xf32>
    %467 = arith.addf %461, %464 : vector<8x32xf32>
    %468 = arith.negf %467 : vector<8x32xf32>
    %469 = math.exp %468 : vector<8x32xf32>
    %cst_153 = arith.constant 1.000000e+00 : f32
    %470 = vector.broadcast %cst_153 : f32 to vector<8x32xf32>
    %471 = arith.addf %470, %469 : vector<8x32xf32>
    %472 = arith.divf %470, %471 : vector<8x32xf32>
    %473 = arith.addf %462, %465 : vector<8x32xf32>
    %474 = arith.negf %473 : vector<8x32xf32>
    %475 = math.exp %474 : vector<8x32xf32>
    %cst_154 = arith.constant 1.000000e+00 : f32
    %476 = vector.broadcast %cst_154 : f32 to vector<8x32xf32>
    %477 = arith.addf %476, %475 : vector<8x32xf32>
    %478 = arith.divf %476, %477 : vector<8x32xf32>
    %479 = arith.mulf %472, %466 : vector<8x32xf32>
    %480 = arith.addf %463, %479 : vector<8x32xf32>
    %481 = math.tanh %480 : vector<8x32xf32>
    %cst_155 = arith.constant 1.000000e+00 : f32
    %482 = vector.broadcast %cst_155 : f32 to vector<8x32xf32>
    %483 = arith.subf %482, %478 : vector<8x32xf32>
    %484 = arith.mulf %483, %481 : vector<8x32xf32>
    %485 = arith.mulf %478, %453 : vector<8x32xf32>
    %486 = arith.addf %484, %485 : vector<8x32xf32>
    %c5_i32_156 = arith.constant 5 : i32
    %c8_i32_157 = arith.constant 8 : i32
    %487 = arith.muli %c5_i32_156, %c8_i32_157 : i32
    %488 = tpu.assume_multiple %487, 8 : i32
    %489 = arith.index_cast %488 : i32 to index
    %c0_158 = arith.constant 0 : index
    %490 = vector.load %arg13[%489, %c0_158] : memref<64x128xf32, #tpu.memory_space<vmem>>, vector<8x128xf32>
    %c0_159 = arith.constant 0 : index
    %c0_160 = arith.constant 0 : index
    %491 = vector.load %arg7[%c0_159, %c0_160] : memref<32x128xf32, #tpu.memory_space<vmem>>, vector<32x128xf32>
    %cst_161 = arith.constant dense<0.000000e+00> : vector<8x128xf32>
    %492 = tpu.matmul %486, %491, %cst_161 {dimension_numbers = #tpu.dot_dimension_numbers<[1], [0], [0], [1], [0, 0, 1, 1], [], []>} : vector<8x32xf32>, vector<32x128xf32>, vector<8x128xf32> -> vector<8x128xf32>
    %493 = arith.addf %492, %320 : vector<8x128xf32>
    %494 = vector.extract_strided_slice %490 {offsets = [0, 0], sizes = [8, 32], strides = [1, 1]} : vector<8x128xf32> to vector<8x32xf32>
    %495 = vector.extract_strided_slice %490 {offsets = [0, 32], sizes = [8, 32], strides = [1, 1]} : vector<8x128xf32> to vector<8x32xf32>
    %496 = vector.extract_strided_slice %490 {offsets = [0, 64], sizes = [8, 32], strides = [1, 1]} : vector<8x128xf32> to vector<8x32xf32>
    %497 = vector.extract_strided_slice %493 {offsets = [0, 0], sizes = [8, 32], strides = [1, 1]} : vector<8x128xf32> to vector<8x32xf32>
    %498 = vector.extract_strided_slice %493 {offsets = [0, 32], sizes = [8, 32], strides = [1, 1]} : vector<8x128xf32> to vector<8x32xf32>
    %499 = vector.extract_strided_slice %493 {offsets = [0, 64], sizes = [8, 32], strides = [1, 1]} : vector<8x128xf32> to vector<8x32xf32>
    %500 = arith.addf %494, %497 : vector<8x32xf32>
    %501 = arith.negf %500 : vector<8x32xf32>
    %502 = math.exp %501 : vector<8x32xf32>
    %cst_162 = arith.constant 1.000000e+00 : f32
    %503 = vector.broadcast %cst_162 : f32 to vector<8x32xf32>
    %504 = arith.addf %503, %502 : vector<8x32xf32>
    %505 = arith.divf %503, %504 : vector<8x32xf32>
    %506 = arith.addf %495, %498 : vector<8x32xf32>
    %507 = arith.negf %506 : vector<8x32xf32>
    %508 = math.exp %507 : vector<8x32xf32>
    %cst_163 = arith.constant 1.000000e+00 : f32
    %509 = vector.broadcast %cst_163 : f32 to vector<8x32xf32>
    %510 = arith.addf %509, %508 : vector<8x32xf32>
    %511 = arith.divf %509, %510 : vector<8x32xf32>
    %512 = arith.mulf %505, %499 : vector<8x32xf32>
    %513 = arith.addf %496, %512 : vector<8x32xf32>
    %514 = math.tanh %513 : vector<8x32xf32>
    %cst_164 = arith.constant 1.000000e+00 : f32
    %515 = vector.broadcast %cst_164 : f32 to vector<8x32xf32>
    %516 = arith.subf %515, %511 : vector<8x32xf32>
    %517 = arith.mulf %516, %514 : vector<8x32xf32>
    %518 = arith.mulf %511, %486 : vector<8x32xf32>
    %519 = arith.addf %517, %518 : vector<8x32xf32>
    %c6_i32_165 = arith.constant 6 : i32
    %c8_i32_166 = arith.constant 8 : i32
    %520 = arith.muli %c6_i32_165, %c8_i32_166 : i32
    %521 = tpu.assume_multiple %520, 8 : i32
    %522 = arith.index_cast %521 : i32 to index
    %c0_167 = arith.constant 0 : index
    %523 = vector.load %arg13[%522, %c0_167] : memref<64x128xf32, #tpu.memory_space<vmem>>, vector<8x128xf32>
    %c0_168 = arith.constant 0 : index
    %c0_169 = arith.constant 0 : index
    %524 = vector.load %arg7[%c0_168, %c0_169] : memref<32x128xf32, #tpu.memory_space<vmem>>, vector<32x128xf32>
    %cst_170 = arith.constant dense<0.000000e+00> : vector<8x128xf32>
    %525 = tpu.matmul %519, %524, %cst_170 {dimension_numbers = #tpu.dot_dimension_numbers<[1], [0], [0], [1], [0, 0, 1, 1], [], []>} : vector<8x32xf32>, vector<32x128xf32>, vector<8x128xf32> -> vector<8x128xf32>
    %526 = arith.addf %525, %320 : vector<8x128xf32>
    %527 = vector.extract_strided_slice %523 {offsets = [0, 0], sizes = [8, 32], strides = [1, 1]} : vector<8x128xf32> to vector<8x32xf32>
    %528 = vector.extract_strided_slice %523 {offsets = [0, 32], sizes = [8, 32], strides = [1, 1]} : vector<8x128xf32> to vector<8x32xf32>
    %529 = vector.extract_strided_slice %523 {offsets = [0, 64], sizes = [8, 32], strides = [1, 1]} : vector<8x128xf32> to vector<8x32xf32>
    %530 = vector.extract_strided_slice %526 {offsets = [0, 0], sizes = [8, 32], strides = [1, 1]} : vector<8x128xf32> to vector<8x32xf32>
    %531 = vector.extract_strided_slice %526 {offsets = [0, 32], sizes = [8, 32], strides = [1, 1]} : vector<8x128xf32> to vector<8x32xf32>
    %532 = vector.extract_strided_slice %526 {offsets = [0, 64], sizes = [8, 32], strides = [1, 1]} : vector<8x128xf32> to vector<8x32xf32>
    %533 = arith.addf %527, %530 : vector<8x32xf32>
    %534 = arith.negf %533 : vector<8x32xf32>
    %535 = math.exp %534 : vector<8x32xf32>
    %cst_171 = arith.constant 1.000000e+00 : f32
    %536 = vector.broadcast %cst_171 : f32 to vector<8x32xf32>
    %537 = arith.addf %536, %535 : vector<8x32xf32>
    %538 = arith.divf %536, %537 : vector<8x32xf32>
    %539 = arith.addf %528, %531 : vector<8x32xf32>
    %540 = arith.negf %539 : vector<8x32xf32>
    %541 = math.exp %540 : vector<8x32xf32>
    %cst_172 = arith.constant 1.000000e+00 : f32
    %542 = vector.broadcast %cst_172 : f32 to vector<8x32xf32>
    %543 = arith.addf %542, %541 : vector<8x32xf32>
    %544 = arith.divf %542, %543 : vector<8x32xf32>
    %545 = arith.mulf %538, %532 : vector<8x32xf32>
    %546 = arith.addf %529, %545 : vector<8x32xf32>
    %547 = math.tanh %546 : vector<8x32xf32>
    %cst_173 = arith.constant 1.000000e+00 : f32
    %548 = vector.broadcast %cst_173 : f32 to vector<8x32xf32>
    %549 = arith.subf %548, %544 : vector<8x32xf32>
    %550 = arith.mulf %549, %547 : vector<8x32xf32>
    %551 = arith.mulf %544, %519 : vector<8x32xf32>
    %552 = arith.addf %550, %551 : vector<8x32xf32>
    %c7_i32_174 = arith.constant 7 : i32
    %c8_i32_175 = arith.constant 8 : i32
    %553 = arith.muli %c7_i32_174, %c8_i32_175 : i32
    %554 = tpu.assume_multiple %553, 8 : i32
    %555 = arith.index_cast %554 : i32 to index
    %c0_176 = arith.constant 0 : index
    %556 = vector.load %arg13[%555, %c0_176] : memref<64x128xf32, #tpu.memory_space<vmem>>, vector<8x128xf32>
    %c0_177 = arith.constant 0 : index
    %c0_178 = arith.constant 0 : index
    %557 = vector.load %arg7[%c0_177, %c0_178] : memref<32x128xf32, #tpu.memory_space<vmem>>, vector<32x128xf32>
    %cst_179 = arith.constant dense<0.000000e+00> : vector<8x128xf32>
    %558 = tpu.matmul %552, %557, %cst_179 {dimension_numbers = #tpu.dot_dimension_numbers<[1], [0], [0], [1], [0, 0, 1, 1], [], []>} : vector<8x32xf32>, vector<32x128xf32>, vector<8x128xf32> -> vector<8x128xf32>
    %559 = arith.addf %558, %320 : vector<8x128xf32>
    %560 = vector.extract_strided_slice %556 {offsets = [0, 0], sizes = [8, 32], strides = [1, 1]} : vector<8x128xf32> to vector<8x32xf32>
    %561 = vector.extract_strided_slice %556 {offsets = [0, 32], sizes = [8, 32], strides = [1, 1]} : vector<8x128xf32> to vector<8x32xf32>
    %562 = vector.extract_strided_slice %556 {offsets = [0, 64], sizes = [8, 32], strides = [1, 1]} : vector<8x128xf32> to vector<8x32xf32>
    %563 = vector.extract_strided_slice %559 {offsets = [0, 0], sizes = [8, 32], strides = [1, 1]} : vector<8x128xf32> to vector<8x32xf32>
    %564 = vector.extract_strided_slice %559 {offsets = [0, 32], sizes = [8, 32], strides = [1, 1]} : vector<8x128xf32> to vector<8x32xf32>
    %565 = vector.extract_strided_slice %559 {offsets = [0, 64], sizes = [8, 32], strides = [1, 1]} : vector<8x128xf32> to vector<8x32xf32>
    %566 = arith.addf %560, %563 : vector<8x32xf32>
    %567 = arith.negf %566 : vector<8x32xf32>
    %568 = math.exp %567 : vector<8x32xf32>
    %cst_180 = arith.constant 1.000000e+00 : f32
    %569 = vector.broadcast %cst_180 : f32 to vector<8x32xf32>
    %570 = arith.addf %569, %568 : vector<8x32xf32>
    %571 = arith.divf %569, %570 : vector<8x32xf32>
    %572 = arith.addf %561, %564 : vector<8x32xf32>
    %573 = arith.negf %572 : vector<8x32xf32>
    %574 = math.exp %573 : vector<8x32xf32>
    %cst_181 = arith.constant 1.000000e+00 : f32
    %575 = vector.broadcast %cst_181 : f32 to vector<8x32xf32>
    %576 = arith.addf %575, %574 : vector<8x32xf32>
    %577 = arith.divf %575, %576 : vector<8x32xf32>
    %578 = arith.mulf %571, %565 : vector<8x32xf32>
    %579 = arith.addf %562, %578 : vector<8x32xf32>
    %580 = math.tanh %579 : vector<8x32xf32>
    %cst_182 = arith.constant 1.000000e+00 : f32
    %581 = vector.broadcast %cst_182 : f32 to vector<8x32xf32>
    %582 = arith.subf %581, %577 : vector<8x32xf32>
    %583 = arith.mulf %582, %580 : vector<8x32xf32>
    %584 = arith.mulf %577, %552 : vector<8x32xf32>
    %585 = arith.addf %583, %584 : vector<8x32xf32>
    %c8_i32_183 = arith.constant 8 : i32
    %c0_184 = arith.constant 0 : index
    %c0_185 = arith.constant 0 : index
    %586 = vector.load %arg10[%c0_184, %c0_185] : memref<32x128xf32, #tpu.memory_space<vmem>>, vector<32x128xf32>
    %cst_186 = arith.constant dense<0.000000e+00> : vector<8x128xf32>
    %587 = tpu.matmul %585, %586, %cst_186 {dimension_numbers = #tpu.dot_dimension_numbers<[1], [0], [0], [1], [0, 0, 1, 1], [], []>} : vector<8x32xf32>, vector<32x128xf32>, vector<8x128xf32> -> vector<8x128xf32>
    %c0_187 = arith.constant 0 : index
    %c0_188 = arith.constant 0 : index
    %588 = vector.load %arg11[%c0_187, %c0_188] : memref<1x128xf32, #tpu.memory_space<vmem>>, vector<1x128xf32>
    %589 = vector.broadcast %588 : vector<1x128xf32> to vector<8x128xf32>
    %590 = arith.addf %587, %589 : vector<8x128xf32>
    %c0_189 = arith.constant 0 : index
    %c0_190 = arith.constant 0 : index
    %591 = vector.load %arg12[%c0_189, %c0_190] : memref<8x128xf32, #tpu.memory_space<vmem>>, vector<8x128xf32>
    tpu.vector_store %arg12[%c0_189, %c0_190], %590 {strides = array<i32>} : memref<8x128xf32, #tpu.memory_space<vmem>>, vector<8x128xf32>,
    return
  }
  func.func @transform_0(%arg0: i32) -> (i32, i32) {
    %c0_i32 = arith.constant 0 : i32
    %c0_i32_0 = arith.constant 0 : i32
    return %arg0, %c0_i32 : i32, i32
  }
  func.func @transform_1(%arg0: i32) -> (i32, i32) {
    %c0_i32 = arith.constant 0 : i32
    %c0_i32_0 = arith.constant 0 : i32
    %c0_i32_1 = arith.constant 0 : i32
    return %c0_i32, %c0_i32_0 : i32, i32
  }
  func.func @transform_2(%arg0: i32) -> (i32, i32) {
    %c0_i32 = arith.constant 0 : i32
    %c0_i32_0 = arith.constant 0 : i32
    %c0_i32_1 = arith.constant 0 : i32
    return %c0_i32, %c0_i32_0 : i32, i32
  }
  func.func @transform_3(%arg0: i32) -> (i32, i32) {
    %c0_i32 = arith.constant 0 : i32
    %c0_i32_0 = arith.constant 0 : i32
    %c0_i32_1 = arith.constant 0 : i32
    return %c0_i32, %c0_i32_0 : i32, i32
  }
  func.func @transform_4(%arg0: i32) -> (i32, i32) {
    %c0_i32 = arith.constant 0 : i32
    %c0_i32_0 = arith.constant 0 : i32
    %c0_i32_1 = arith.constant 0 : i32
    return %c0_i32, %c0_i32_0 : i32, i32
  }
  func.func @transform_5(%arg0: i32) -> (i32, i32) {
    %c0_i32 = arith.constant 0 : i32
    %c0_i32_0 = arith.constant 0 : i32
    %c0_i32_1 = arith.constant 0 : i32
    return %c0_i32, %c0_i32_0 : i32, i32
  }
  func.func @transform_6(%arg0: i32) -> (i32, i32) {
    %c0_i32 = arith.constant 0 : i32
    %c0_i32_0 = arith.constant 0 : i32
    %c0_i32_1 = arith.constant 0 : i32
    return %c0_i32, %c0_i32_0 : i32, i32
  }
  func.func @transform_7(%arg0: i32) -> (i32, i32) {
    %c0_i32 = arith.constant 0 : i32
    %c0_i32_0 = arith.constant 0 : i32
    %c0_i32_1 = arith.constant 0 : i32
    return %c0_i32, %c0_i32_0 : i32, i32
  }
  func.func @transform_8(%arg0: i32) -> (i32, i32) {
    %c0_i32 = arith.constant 0 : i32
    %c0_i32_0 = arith.constant 0 : i32
    %c0_i32_1 = arith.constant 0 : i32
    return %c0_i32, %c0_i32_0 : i32, i32
  }
  func.func @transform_9(%arg0: i32) -> (i32, i32) {
    %c0_i32 = arith.constant 0 : i32
    %c0_i32_0 = arith.constant 0 : i32
    %c0_i32_1 = arith.constant 0 : i32
    return %c0_i32, %c0_i32_0 : i32, i32
  }
  func.func @transform_10(%arg0: i32) -> (i32, i32) {
    %c0_i32 = arith.constant 0 : i32
    %c0_i32_0 = arith.constant 0 : i32
    %c0_i32_1 = arith.constant 0 : i32
    return %c0_i32, %c0_i32_0 : i32, i32
  }
  func.func @transform_11(%arg0: i32) -> (i32, i32) {
    %c0_i32 = arith.constant 0 : i32
    %c0_i32_0 = arith.constant 0 : i32
    return %arg0, %c0_i32 : i32, i32
  }
}

</mosaic_0001>

<bundles_post_ra>
// kernel: tpu_custom_call.1
= control target key start
LH: loop header
LB: loop body
LE: loop exit
PB: predicated region body
PF: predicated region fallthrough
CT: control target
= control target key end

     0   :  { %16 = vsyncpa [#allocation4], 0  ;;  %s4044_s0 = inlined_call_operand.vmem [shape: f32[64,4], index: 0, kind: input, shape index: {}]   ;;  %s4045_s1 = inlined_call_operand.hbm [shape: f32[4,128], index: 1, kind: input, shape index: {}]   ;;  %s4046_s2 = inlined_call_operand.vmem [shape: f32[32,128], index: 2, kind: input, shape index: {}]   ;;  %s4047_s3 = inlined_call_operand.vmem [shape: f32[1,128], index: 3, kind: input, shape index: {}]   ;;  %s4048_s4 = inlined_call_operand.vmem [shape: f32[1,128], index: 4, kind: input, shape index: {}]   ;;  %s4049_s5 = inlined_call_operand.vmem [shape: f32[32,128], index: 5, kind: input, shape index: {}]   ;;  %s4050_s6 = inlined_call_operand.hbm [shape: f32[32,128], index: 6, kind: input, shape index: {}]   ;;  %s4051_s7 = inlined_call_operand.hbm [shape: f32[1,128], index: 7, kind: input, shape index: {}]   ;;  %s4052_s8 = inlined_call_operand.hbm [shape: f32[1,128], index: 8, kind: input, shape index: {}]   ;;  %s4053_s9 = inlined_call_operand.vmem [shape: f32[32,128], index: 9, kind: input, shape index: {}]   ;;  %s4054_s10 = inlined_call_operand.vmem [shape: f32[1,128], index: 10, kind: input, shape index: {}]   ;;  %s4055_s11 = inlined_call_operand.hbm [shape: f32[8,128], index: 11, kind: output, shape index: {}]  }
   0x1   :  { %17 = vsyncpa [#allocation7], 0 }
   0x2   :  { %18 = vsyncpa [#allocation10], 0 }
   0x3   :  { %19 = vsyncpa [#allocation5], 0  ;;  %s3497_s17 = smov [#allocation6]   ;;  %s3379_s21 = scalar_lea.hbm %s4050_s6, 512 }
   0x4   :  { %s45_s18 = sshll.u32 %s3497_s17, 4  ;;  %p3380_p0 = scmp.ne.s32.totalorder %s4050_s6, %s3379_s21  ;;  %s46_s18 = int_to_ptr.vmem [resolvable:$true] %s45_s18 }
   0x5   :  { %p3383_p1 = scmp.lt.u32.totalorder %s3379_s21, %s4050_s6 }
   0x7   :  { %p3385_p2 = pnand %p3383_p1, %p3380_p0 }
   0x9   :  { %3388 = shalt.err (!%p3385_p2)
}
   0xa   :  { %s3389_s26 = scalar_lea.vmem %s46_s18, 512  ;;  %p3394_p4 = scmp.lt.s32.totalorder %s46_s18, %s46_s18 }
   0xb   :  { %p3390_p3 = scmp.ne.s32.totalorder %s46_s18, %s3389_s26  ;;  %p3395_p5 = scmp.lt.s32.totalorder %s3389_s26, %s3389_s26 }
   0xd   :  { %p3396_p6 = por %p3395_p5, %p3394_p4 }
   0xf   :  { %p3397_p7 = pnand %p3396_p6, %p3390_p3 }
  0x11   :  { %3400 = shalt.err (!%p3397_p7)
}
  0x12   :  { %s3498_s27 = smov 128   ;;  %s3499_s28 = smov 8  }
  0x13   :  { %51 = dma.hbm_to_vmem [thread:$0]  %s4050_s6, 512, %s46_s18, [#allocation7], %s3498_s27, %s3498_s27, %s3499_s28  }
  0x14   :  { %s3500_s12 = smov [#allocation3]   ;;  %s3501_s14 = smov [#allocation8]  }
  0x15   :  { %s28_s13 = sshll.u32 %s3500_s12, 4  ;;  %s58_s15 = sshll.u32 %s3501_s14, 4  ;;  %s29_s13 = int_to_ptr.vmem [resolvable:$true] %s28_s13  ;;  %s59_s15 = int_to_ptr.vmem [resolvable:$true] %s58_s15 }
  0x16   :  { %s3401_s19 = scalar_lea.hbm %s4045_s1, 64 }
  0x17   :  { %p3402_p8 = scmp.ne.s32.totalorder %s4045_s1, %s3401_s19  ;;  %p3405_p9 = scmp.lt.u32.totalorder %s3401_s19, %s4045_s1 }
  0x19   :  { %p3407_p10 = pnand %p3405_p9, %p3402_p8 }
  0x1b   :  { %3410 = shalt.err (!%p3407_p10)
}
  0x1c   :  { %s3411_s6 = scalar_lea.vmem %s29_s13, 64  ;;  %p3416_p12 = scmp.lt.s32.totalorder %s29_s13, %s29_s13 }
  0x1d   :  { %p3412_p11 = scmp.ne.s32.totalorder %s29_s13, %s3411_s6  ;;  %p3417_p13 = scmp.lt.s32.totalorder %s3411_s6, %s3411_s6 }
  0x1f   :  { %p3418_p0 = por %p3417_p13, %p3416_p12 }
  0x21   :  { %p3419_p1 = pnand %p3418_p0, %p3412_p11 }
  0x23   :  { %3422 = shalt.err (!%p3419_p1)
}
  0x24   :  { %31 = dma.hbm_to_vmem [thread:$0]  %s4045_s1, 64, %s29_s13, [#allocation4]  }
  0x25   :  { %s3423_s27 = scalar_lea.hbm %s4051_s7, 16 }
  0x26   :  { %p3424_p2 = scmp.ne.s32.totalorder %s4051_s7, %s3423_s27  ;;  %p3427_p3 = scmp.lt.u32.totalorder %s3423_s27, %s4051_s7 }
  0x28   :  { %p3429_p4 = pnand %p3427_p3, %p3424_p2 }
  0x2a   :  { %3432 = shalt.err (!%p3429_p4)
}
  0x2b   :  { %s3433_s14 = scalar_lea.vmem %s59_s15, 16  ;;  %s3437_s16 = scalar_lea.vmem %s59_s15, 32 }
  0x2c   :  { %p3434_p5 = scmp.ne.s32.totalorder %s59_s15, %s3433_s14  ;;  %p3438_p6 = scmp.lt.s32.totalorder %s59_s15, %s59_s15 }
  0x2d   :  { %p3439_p7 = scmp.lt.s32.totalorder %s3437_s16, %s3433_s14 }
  0x2f   :  { %p3440_p8 = por %p3439_p7, %p3438_p6 }
  0x31   :  { %p3441_p9 = pnand %p3440_p8, %p3434_p5 }
  0x33   :  { %3444 = shalt.err (!%p3441_p9)
}
  0x34   :  { %61 = dma.hbm_to_vmem [thread:$0]  %s4051_s7, 16, %s59_s15, [#allocation7]  }
  0x35   :  { %s3502_s17 = smov [#allocation9]   ;;  %s3445_s22 = scalar_lea.hbm %s4052_s8, 16 }
  0x36   :  { %s68_s19 = sshll.u32 %s3502_s17, 4  ;;  %p3446_p10 = scmp.ne.s32.totalorder %s4052_s8, %s3445_s22  ;;  %s69_s19 = int_to_ptr.vmem [resolvable:$true] %s68_s19 }
  0x37   :  { %p3449_p11 = scmp.lt.u32.totalorder %s3445_s22, %s4052_s8 }
  0x39   :  { %p3451_p12 = pnand %p3449_p11, %p3446_p10 }
  0x3b   :  { %3454 = shalt.err (!%p3451_p12)
}
  0x3c   :  { %s3455_s25 = scalar_lea.vmem %s69_s19, 16  ;;  %s3459_s7 = scalar_lea.vmem %s69_s19, 32 }
  0x3d   :  { %p3456_p13 = scmp.ne.s32.totalorder %s69_s19, %s3455_s25  ;;  %p3460_p0 = scmp.lt.s32.totalorder %s69_s19, %s69_s19 }
  0x3e   :  { %p3461_p1 = scmp.lt.s32.totalorder %s3459_s7, %s3455_s25 }
  0x40   :  { %p3462_p2 = por %p3461_p1, %p3460_p0 }
  0x42   :  { %p3463_p3 = pnand %p3462_p2, %p3456_p13 }
  0x44   :  { %3466 = shalt.err (!%p3463_p3)
}
  0x45   :  { %71 = dma.hbm_to_vmem [thread:$0]  %s4052_s8, 16, %s69_s19, [#allocation10]  }
  0x46   :  { %3489 = dma.done.wait [#allocation4], 64  }
  0x47   :  { %3490 = vsyncadd [#allocation4], 4294967232 }
  0x48   :  { %3491 = dma.done.wait [#allocation7], 528  }
  0x49   :  { %3492 = vsyncadd [#allocation7], 4294966768 }
  0x4a   :  { %3493 = dma.done.wait [#allocation10], 16  }
  0x4b   :  { %3494 = vsyncadd [#allocation10], 4294967280  ;;  %v3503_v0 = vmov 0.0|0.0   ;;  %vm3504_vm0 = vmmov 0   ;;  %v3505_v1 = vmov 0.0   ;;  %vm129_vm1 = vcmask 1043456  }
  0x4c   :  { %3121 = vmatprep.subr.bf16.mxu1 %v3503_v0  ;;  %2854 = vmatprep.mubr.msk.f32.mxu1 %vm3504_vm0, %v3505_v1  ;;  %vm104_vm2 = vcmask 31744   ;;  %v261_v2 = vld [vmem:[%s4046_s2] sm:$0xff]  ;;  %v262_v3 = vld [vmem:[%s4046_s2 + $0x8] sm:$0xff]  ;;  %v263_v6 = vld [vmem:[%s4046_s2 + $0x10] sm:$0xff]  ;;  %s3506_s21 = smov 64   ;;  %vm265_vm3 = vcmask 261120  }
  0x4d   :  { %v96_v4 = vld [vmem:[#allocation3] sm:$0xf]  ;;  %v3626_v5 = vpack.c.bf16 %v262_v3, %v261_v2  ;;  %v264_v7 = vld [vmem:[%s4046_s2 + $0x18] sm:$0xff]  ;;  %v89_v9 = vld [vmem:[%s4044_s0 + $0x8] sm:$0xff] }
  0x4e   :  { %2832 = vmatprep.subr.msk.mxu0 %vm129_vm1, %v96_v4  ;;  %v88_v8 = vld [vmem:[%s4044_s0] sm:$0xff]  ;;  %v3642_v10 = vpack.c.bf16 %v264_v7, %v263_v6  ;;  %v90_v28 = vld [vmem:[%s4044_s0 + $0x10] sm:$0xff]  ;;  %v91_v29 = vld [vmem:[%s4044_s0 + $0x18] sm:$0xff] }
  0x4f   :  { %2833 = vmatpush3.msk.msra.mxu0 %vm129_vm1, %v96_v4  ;;  %2834 = vmatprep.mubr.msk.f32.mxu0 %vm104_vm2, %v88_v8  ;;  %v3661_v13 = vld [vmem:[%s4048_s4] ss:$0 sm:$0xff]  ;;  %v366_v32 = vld [vmem:[%s4049_s5 + $0x8] sm:$0xff]  ;;  %v367_v34 = vld [vmem:[%s4049_s5 + $0x10] sm:$0xff] }
  0x50   :  { %3123 = vmatpush3.bf16.msra.mxu1 %v3626_v5  ;;  %2835 = vmatmul.mubr.msk.f32.vlgmr.msra.gmra.mrb[0].mxu0 %vm104_vm2, %v89_v9  ;;  %v3668_v17 = vld [vmem:[%s4047_s3] ss:$0 sm:$0xff]  ;;  %v93_v35 = vld [vmem:[%s4044_s0 + $0x28] sm:$0xff]  ;;  %v368_v36 = vld [vmem:[%s4049_s5 + $0x18] sm:$0xff]  ;;  %s3508_s3 = smov [#allocation11]  }
  0x51   :  { %3124 = vmatprep.subr.bf16.mxu1 %v3503_v0  ;;  %3133 = vmatprep.subr.bf16.mxu0 %v3503_v0  ;;  %v92_v30 = vld [vmem:[%s4044_s0 + $0x20] sm:$0xff]  ;;  %v94_v37 = vld [vmem:[%s4044_s0 + $0x30] sm:$0xff]  ;;  %v3705_v38 = vpack.c.bf16 %v368_v36, %v367_v34  ;;  %v95_v39 = vld [vmem:[%s4044_s0 + $0x38] sm:$0xff]  ;;  %s2634_s18 = sshll.u32 %s3508_s3, 4  ;;  %s2635_s18 = int_to_ptr.vmem [resolvable:$true] %s2634_s18 }
  0x52   :  { %3135 = vmatpush3.bf16.msra.mxu0 %v3626_v5  ;;  %2837 = vmatprep.mubr.msk.f32.mxu0 %vm104_vm2, %v90_v28  ;;  %v365_v31 = vld [vmem:[%s4049_s5] sm:$0xff]  ;;  %s3507_s5 = smov 96   ;;  %s3467_s24 = scalar_lea.vmem %s2635_s18, 128 }
  0x53   :  { %3136 = vmatprep.subr.bf16.mxu0 %v3503_v0  ;;  %v3689_v33 = vpack.c.bf16 %v366_v32, %v365_v31  ;;  %p3468_p4 = scmp.ne.s32.totalorder %s2635_s18, %s3467_s24  ;;  %p3472_p5 = scmp.lt.s32.totalorder %s2635_s18, %s2635_s18 }
  0x54   :  { %3126 = vmatpush3.bf16.msra.mxu1 %v3642_v10  ;;  %2838 = vmatmul.mubr.msk.f32.gmra.mrb[2].mxu0 %vm104_vm2, %v91_v29  ;;  %p3473_p6 = scmp.lt.s32.totalorder %s3467_s24, %s3467_s24 }
  0x55   :  { %3127 = vmatprep.subr.bf16.mxu1 %v3503_v0  ;;  %2840 = vmatprep.mubr.msk.f32.mxu0 %vm104_vm2, %v92_v30 }
  0x56   :  { %3138 = vmatpush3.bf16.msra.mxu0 %v3642_v10  ;;  %p3474_p7 = por %p3473_p6, %p3472_p5 }
  0x57   :  { %2855 = vmatmul.mubr.f32.vlgmr.msra.gmra.mrb[0].mxu1 %v3505_v1  ;;  %3145 = vmatprep.subr.bf16.mxu0 %v3503_v0 }
  0x58   :  { %2865 = vmatprep.mubr.msk.f32.mxu1 %vm3504_vm0, %v3505_v1  ;;  %3129 = vmatpush3.bf16.msra.mxu1 %v3689_v33  ;;  %p3475_p8 = pnand %p3474_p7, %p3468_p4 }
  0x59   :  { %3130 = vmatprep.subr.bf16.mxu1 %v3503_v0  ;;  %2841 = vmatmul.mubr.msk.f32.gmra.mrb[4].mxu0 %vm104_vm2, %v93_v35 }
  0x5a   :  { %2843 = vmatprep.mubr.msk.f32.mxu0 %vm104_vm2, %v94_v37 }
  0x5c   :  { %3132 = vmatpush3.bf16.msra.mxu1 %v3705_v38 }
  0x5d   :  { %3139 = vmatprep.subr.bf16.mxu1 %v3503_v0  ;;  %2844 = vmatmul.mubr.msk.f32.gmra.mrb[6].mxu0 %vm104_vm2, %v95_v39 }
  0x5e   :  { %2876 = vmatprep.mubr.msk.f32.mxu0 %vm3504_vm0, %v3505_v1 }
 0x123   :  { %v3656_v11 = vpop.f32.mrb[0].mxu0 }
 0x124   :  { %v199_v12 = vpop.f32.mrb[1].mxu0  ;;  %v205_v58 = vadd.f32 %v3656_v11, %v3668_v17 }
 0x125   :  { %v200_v18 = vadd.f32 %v3668_v17, %v199_v12 }
 0x127   :  { %v3720_v46 = vpop.f32.mrb[2].mxu0 }
 0x128   :  { %v3722_v47 = vpop.f32.mrb[3].mxu0 }
 0x12a   :  { %v335_v14 = vpop.f32.mrb[0].mxu1 }
 0x12b   :  { %v336_v15 = vadd.f32 %v3661_v13, %v335_v14  ;;  %v2856_v16 = vpop.f32.mrb[1].mxu1 }
 0x12c   :  { %v3724_v48 = vpop.f32.mrb[4].mxu0 }
 0x12d   :  { %347 = vrot.lane.b32.xlu0 %v336_v15, %s3506_s21  ;;  %v339_v19 = vadd.f32 %v336_v15, %v200_v18  ;;  %v3726_v49 = vpop.f32.mrb[5].mxu0 }
 0x12f   :  { %v2657_v20 = vmul.f32 -1.442695, %v339_v19 }
 0x130   :  { %v3728_v50 = vpop.f32.mrb[6].mxu0 }
 0x131   :  { %3283 = vpow2.f32 %v2657_v20  ;;  %v3730_v51 = vpop.f32.mrb[7].mxu0 }
 0x13b   :  { %v3284_v21 = vpop.eup %3283 }
 0x13c   :  { %v343_v22 = vadd.f32 1.0, %v3284_v21 }
 0x13e   :  { %3285 = vrcp.f32 %v343_v22  ;;  %v210_v22 = vadd.f32 %v3668_v17, %v3722_v47  ;;  %v215_v47 = vadd.f32 %v3720_v46, %v3668_v17 }
 0x148   :  { %v3286_v23 = vpop.eup %3285 }
 0x149   :  { %v357_v41 = vsub.f32 1.0, %v3286_v23  ;;  %v363_v43 = vmul.f32 0.0, %v3286_v23 }
 0x19f   :  { %v348_v24 = vpop.permute.xlu0 %347 }
 0x1a0   :  { %v350_v25 = vmul.f32 %v3286_v23, %v348_v24 }
 0x1a2   :  { %352 = vrot.lane.b32.xlu0 %v350_v25, %s3506_s21 }
 0x214   :  { %v353_v26 = vpop.permute.xlu0 %352 }
 0x215   :  { %v355_v27 = vadd.f32 %v353_v26, %v200_v18 }
 0x217   :  { %3287 = vtanh.f32 %v355_v27 }
 0x221   :  { %v3288_v40 = vpop.eup %3287 }
 0x222   :  { %359 = vrot.lane.b32.xlu1 %v3288_v40, %s3507_s5 }
 0x294   :  { %v360_v42 = vpop.permute.xlu1 %359 }
 0x295   :  { %v362_v44 = vmul.f32 %v360_v42, %v357_v41 }
 0x297   :  { %v364_v45 = vadd.f32 %v363_v43, %v362_v44 }
 0x299   :  { %370 = vrot.lane.b32.xlu1 %v364_v45, %s3507_s5 }
 0x30b   :  { %v371_v52 = vpop.permute.xlu1 %370 }
 0x30c   :  { %2866 = vmatmul.mubr.msk.f32.vlgmr.msra.gmra.mrb[2].mxu1 %vm265_vm3, %v371_v52  ;;  %2877 = vmatmul.mubr.msk.f32.vlgmr.msra.gmra.mrb[8].mxu0 %vm265_vm3, %v371_v52 }
 0x30d   :  { %3141 = vmatpush3.bf16.msra.mxu1 %v3689_v33  ;;  %3147 = vmatpush3.bf16.msra.mxu0 %v3626_v5 }
 0x30e   :  { %3142 = vmatprep.subr.bf16.mxu1 %v3503_v0  ;;  %3148 = vmatprep.subr.bf16.mxu0 %v3503_v0 }
 0x30f   :  { %2898 = vmatprep.mubr.msk.f32.mxu0 %vm3504_vm0, %v3505_v1  ;;  %2887 = vmatprep.mubr.msk.f32.mxu1 %vm3504_vm0, %v3505_v1 }
 0x311   :  { %3144 = vmatpush3.bf16.msra.mxu1 %v3705_v38  ;;  %3150 = vmatpush3.bf16.msra.mxu0 %v3642_v10 }
 0x312   :  { %3151 = vmatprep.subr.bf16.mxu1 %v3503_v0  ;;  %3157 = vmatprep.subr.bf16.mxu0 %v3503_v0 }
 0x3df   :  { %v3746_v53 = vpop.f32.mrb[2].mxu1  ;;  %v517_v54 = vpop.f32.mrb[8].mxu0 }
 0x3e0   :  { %v518_v55 = vadd.f32 %v3661_v13, %v517_v54  ;;  %v2867_v56 = vpop.f32.mrb[3].mxu1  ;;  %v2878_v57 = vpop.f32.mrb[9].mxu0 }
 0x3e2   :  { %529 = vrot.lane.b32.xlu0 %v518_v55, %s3506_s21  ;;  %v521_v59 = vadd.f32 %v518_v55, %v205_v58 }
 0x3e4   :  { %v2660_v60 = vmul.f32 -1.442695, %v521_v59 }
 0x3e6   :  { %3289 = vpow2.f32 %v2660_v60 }
 0x3f0   :  { %v3290_v61 = vpop.eup %3289 }
 0x3f1   :  { %v525_v62 = vadd.f32 1.0, %v3290_v61 }
 0x3f3   :  { %3291 = vrcp.f32 %v525_v62 }
 0x3fd   :  { %v3292_v63 = vpop.eup %3291 }
 0x3fe   :  { %v539_v8 = vsub.f32 1.0, %v3292_v63  ;;  %v545_v11 = vmul.f32 %v3292_v63, %v364_v45 }
 0x454   :  { %v530_v2 = vpop.permute.xlu0 %529 }
 0x455   :  { %v532_v3 = vmul.f32 %v3292_v63, %v530_v2 }
 0x457   :  { %534 = vrot.lane.b32.xlu1 %v532_v3, %s3506_s21 }
 0x4c9   :  { %v535_v4 = vpop.permute.xlu1 %534 }
 0x4ca   :  { %v537_v6 = vadd.f32 %v535_v4, %v205_v58 }
 0x4cc   :  { %3293 = vtanh.f32 %v537_v6 }
 0x4d6   :  { %v3294_v7 = vpop.eup %3293 }
 0x4d7   :  { %541 = vrot.lane.b32.xlu0 %v3294_v7, %s3507_s5 }
 0x549   :  { %v542_v9 = vpop.permute.xlu0 %541 }
 0x54a   :  { %v544_v12 = vmul.f32 %v542_v9, %v539_v8 }
 0x54c   :  { %v546_v14 = vadd.f32 %v545_v11, %v544_v12 }
 0x54e   :  { %552 = vrot.lane.b32.xlu1 %v546_v14, %s3507_s5 }
 0x5c0   :  { %v553_v15 = vpop.permute.xlu1 %552 }
 0x5c1   :  { %2888 = vmatmul.mubr.msk.f32.vlgmr.msra.gmra.mrb[4].mxu1 %vm265_vm3, %v553_v15  ;;  %2899 = vmatmul.mubr.msk.f32.vlgmr.msra.gmra.mrb[10].mxu0 %vm265_vm3, %v553_v15 }
 0x5c2   :  { %3153 = vmatpush3.bf16.msra.mxu1 %v3689_v33  ;;  %3159 = vmatpush3.bf16.msra.mxu0 %v3626_v5 }
 0x5c3   :  { %3154 = vmatprep.subr.bf16.mxu1 %v3503_v0  ;;  %3160 = vmatprep.subr.bf16.mxu0 %v3503_v0 }
 0x5c4   :  { %2920 = vmatprep.mubr.msk.f32.mxu0 %vm3504_vm0, %v3505_v1  ;;  %2909 = vmatprep.mubr.msk.f32.mxu1 %vm3504_vm0, %v3505_v1 }
 0x5c6   :  { %3156 = vmatpush3.bf16.msra.mxu1 %v3705_v38  ;;  %3162 = vmatpush3.bf16.msra.mxu0 %v3642_v10 }
 0x5c7   :  { %3163 = vmatprep.subr.bf16.mxu1 %v3503_v0  ;;  %3169 = vmatprep.subr.bf16.mxu0 %v3503_v0 }
 0x694   :  { %v3769_v16 = vpop.f32.mrb[4].mxu1  ;;  %v699_v18 = vpop.f32.mrb[10].mxu0 }
 0x695   :  { %v700_v19 = vadd.f32 %v3661_v13, %v699_v18  ;;  %v2889_v20 = vpop.f32.mrb[5].mxu1  ;;  %v2900_v21 = vpop.f32.mrb[11].mxu0 }
 0x697   :  { %711 = vrot.lane.b32.xlu0 %v700_v19, %s3506_s21  ;;  %v703_v23 = vadd.f32 %v700_v19, %v210_v22 }
 0x699   :  { %v2663_v24 = vmul.f32 -1.442695, %v703_v23 }
 0x69b   :  { %3295 = vpow2.f32 %v2663_v24 }
 0x6a5   :  { %v3296_v25 = vpop.eup %3295 }
 0x6a6   :  { %v707_v26 = vadd.f32 1.0, %v3296_v25 }
 0x6a8   :  { %3297 = vrcp.f32 %v707_v26 }
 0x6b2   :  { %v3298_v27 = vpop.eup %3297 }
 0x6b3   :  { %v721_v34 = vsub.f32 1.0, %v3298_v27  ;;  %v727_v36 = vmul.f32 %v3298_v27, %v546_v14  ;;  %v220_v14 = vadd.f32 %v3668_v17, %v3726_v49 }
 0x709   :  { %v712_v28 = vpop.permute.xlu0 %711 }
 0x70a   :  { %v714_v29 = vmul.f32 %v3298_v27, %v712_v28 }
 0x70c   :  { %716 = vrot.lane.b32.xlu1 %v714_v29, %s3506_s21 }
 0x77e   :  { %v717_v30 = vpop.permute.xlu1 %716 }
 0x77f   :  { %v719_v31 = vadd.f32 %v717_v30, %v210_v22 }
 0x781   :  { %3299 = vtanh.f32 %v719_v31 }
 0x78b   :  { %v3300_v32 = vpop.eup %3299 }
 0x78c   :  { %723 = vrot.lane.b32.xlu0 %v3300_v32, %s3507_s5 }
 0x7fe   :  { %v724_v35 = vpop.permute.xlu0 %723 }
 0x7ff   :  { %v726_v37 = vmul.f32 %v724_v35, %v721_v34 }
 0x801   :  { %v728_v39 = vadd.f32 %v727_v36, %v726_v37 }
 0x803   :  { %734 = vrot.lane.b32.xlu1 %v728_v39, %s3507_s5 }
 0x875   :  { %v735_v40 = vpop.permute.xlu1 %734 }
 0x876   :  { %2910 = vmatmul.mubr.msk.f32.vlgmr.msra.gmra.mrb[6].mxu1 %vm265_vm3, %v735_v40  ;;  %2921 = vmatmul.mubr.msk.f32.vlgmr.msra.gmra.mrb[12].mxu0 %vm265_vm3, %v735_v40 }
 0x877   :  { %3165 = vmatpush3.bf16.msra.mxu1 %v3689_v33  ;;  %3171 = vmatpush3.bf16.msra.mxu0 %v3626_v5 }
 0x878   :  { %3166 = vmatprep.subr.bf16.mxu1 %v3503_v0  ;;  %3172 = vmatprep.subr.bf16.mxu0 %v3503_v0 }
 0x879   :  { %2942 = vmatprep.mubr.msk.f32.mxu0 %vm3504_vm0, %v3505_v1  ;;  %2931 = vmatprep.mubr.msk.f32.mxu1 %vm3504_vm0, %v3505_v1 }
 0x87b   :  { %3168 = vmatpush3.bf16.msra.mxu1 %v3705_v38  ;;  %3174 = vmatpush3.bf16.msra.mxu0 %v3642_v10 }
 0x87c   :  { %3175 = vmatprep.subr.bf16.mxu1 %v3503_v0  ;;  %3181 = vmatprep.subr.bf16.mxu0 %v3503_v0 }
 0x949   :  { %v3792_v41 = vpop.f32.mrb[6].mxu1  ;;  %v881_v42 = vpop.f32.mrb[12].mxu0 }
 0x94a   :  { %v882_v43 = vadd.f32 %v3661_v13, %v881_v42  ;;  %v2911_v44 = vpop.f32.mrb[7].mxu1  ;;  %v2922_v45 = vpop.f32.mrb[13].mxu0 }
 0x94c   :  { %893 = vrot.lane.b32.xlu0 %v882_v43, %s3506_s21  ;;  %v885_v52 = vadd.f32 %v882_v43, %v215_v47 }
 0x94e   :  { %v2666_v54 = vmul.f32 -1.442695, %v885_v52 }
 0x950   :  { %3301 = vpow2.f32 %v2666_v54 }
 0x95a   :  { %v3302_v55 = vpop.eup %3301 }
 0x95b   :  { %v889_v56 = vadd.f32 1.0, %v3302_v55 }
 0x95d   :  { %3303 = vrcp.f32 %v889_v56 }
 0x967   :  { %v3304_v57 = vpop.eup %3303 }
 0x968   :  { %v903_v63 = vsub.f32 1.0, %v3304_v57  ;;  %v909_v46 = vmul.f32 %v3304_v57, %v728_v39  ;;  %v225_v39 = vadd.f32 %v3724_v48, %v3668_v17 }
 0x9be   :  { %v894_v58 = vpop.permute.xlu0 %893 }
 0x9bf   :  { %v896_v59 = vmul.f32 %v3304_v57, %v894_v58 }
 0x9c1   :  { %898 = vrot.lane.b32.xlu1 %v896_v59, %s3506_s21 }
 0xa33   :  { %v899_v60 = vpop.permute.xlu1 %898 }
 0xa34   :  { %v901_v61 = vadd.f32 %v899_v60, %v215_v47 }
 0xa36   :  { %3305 = vtanh.f32 %v901_v61 }
 0xa40   :  { %v3306_v62 = vpop.eup %3305 }
 0xa41   :  { %905 = vrot.lane.b32.xlu0 %v3306_v62, %s3507_s5 }
 0xab3   :  { %v906_v2 = vpop.permute.xlu0 %905 }
 0xab4   :  { %v908_v3 = vmul.f32 %v906_v2, %v903_v63 }
 0xab6   :  { %v910_v4 = vadd.f32 %v909_v46, %v908_v3  ;;  %v230_v3 = vadd.f32 %v3668_v17, %v3730_v51 }
 0xab8   :  { %916 = vrot.lane.b32.xlu1 %v910_v4, %s3507_s5 }
 0xb2a   :  { %v917_v6 = vpop.permute.xlu1 %916 }
 0xb2b   :  { %2932 = vmatmul.mubr.msk.f32.vlgmr.msra.gmra.mrb[8].mxu1 %vm265_vm3, %v917_v6  ;;  %2943 = vmatmul.mubr.msk.f32.vlgmr.msra.gmra.mrb[14].mxu0 %vm265_vm3, %v917_v6 }
 0xb2c   :  { %3177 = vmatpush3.bf16.msra.mxu1 %v3689_v33  ;;  %3183 = vmatpush3.bf16.msra.mxu0 %v3626_v5 }
 0xb2d   :  { %3178 = vmatprep.subr.bf16.mxu1 %v3503_v0  ;;  %3184 = vmatprep.subr.bf16.mxu0 %v3503_v0 }
 0xb2e   :  { %2964 = vmatprep.mubr.msk.f32.mxu0 %vm3504_vm0, %v3505_v1  ;;  %2953 = vmatprep.mubr.msk.f32.mxu1 %vm3504_vm0, %v3505_v1 }
 0xb30   :  { %3180 = vmatpush3.bf16.msra.mxu1 %v3705_v38  ;;  %3186 = vmatpush3.bf16.msra.mxu0 %v3642_v10 }
 0xb31   :  { %3187 = vmatprep.subr.bf16.mxu1 %v3503_v0  ;;  %3193 = vmatprep.subr.bf16.mxu0 %v3503_v0 }
 0xbfe   :  { %v3815_v7 = vpop.f32.mrb[8].mxu1  ;;  %v1063_v8 = vpop.f32.mrb[14].mxu0 }
 0xbff   :  { %v1064_v9 = vadd.f32 %v3661_v13, %v1063_v8  ;;  %v2933_v11 = vpop.f32.mrb[9].mxu1  ;;  %v2944_v12 = vpop.f32.mrb[15].mxu0 }
 0xc01   :  { %1075 = vrot.lane.b32.xlu0 %v1064_v9, %s3506_s21  ;;  %v1067_v15 = vadd.f32 %v1064_v9, %v220_v14 }
 0xc03   :  { %v2669_v18 = vmul.f32 -1.442695, %v1067_v15 }
 0xc05   :  { %3307 = vpow2.f32 %v2669_v18 }
 0xc0f   :  { %v3308_v19 = vpop.eup %3307 }
 0xc10   :  { %v1071_v20 = vadd.f32 1.0, %v3308_v19 }
 0xc12   :  { %3309 = vrcp.f32 %v1071_v20 }
 0xc1c   :  { %v3310_v21 = vpop.eup %3309 }
 0xc1d   :  { %v1085_v27 = vsub.f32 1.0, %v3310_v21  ;;  %v1091_v49 = vmul.f32 %v3310_v21, %v910_v4 }
 0xc73   :  { %v1076_v22 = vpop.permute.xlu0 %1075 }
 0xc74   :  { %v1078_v23 = vmul.f32 %v3310_v21, %v1076_v22 }
 0xc76   :  { %1080 = vrot.lane.b32.xlu1 %v1078_v23, %s3506_s21  ;;  %v1727_v23 = vld [vmem:[#allocation6] sm:$0xff] }
 0xce8   :  { %v1081_v24 = vpop.permute.xlu1 %1080 }
 0xce9   :  { %v1083_v25 = vadd.f32 %v1081_v24, %v220_v14  ;;  %v1728_v24 = vld [vmem:[#allocation6 + $0x8] sm:$0xff] }
 0xceb   :  { %3311 = vtanh.f32 %v1083_v25  ;;  %v3873_v25 = vpack.c.bf16 %v1728_v24, %v1727_v23 }
 0xcf5   :  { %v3312_v26 = vpop.eup %3311 }
 0xcf6   :  { %1087 = vrot.lane.b32.xlu0 %v3312_v26, %s3507_s5  ;;  %v1729_v26 = vld [vmem:[#allocation6 + $0x10] sm:$0xff] }
 0xd68   :  { %v1088_v28 = vpop.permute.xlu0 %1087 }
 0xd69   :  { %v1090_v29 = vmul.f32 %v1088_v28, %v1085_v27  ;;  %v1730_v27 = vld [vmem:[#allocation6 + $0x18] sm:$0xff] }
 0xd6b   :  { %v1092_v30 = vadd.f32 %v1091_v49, %v1090_v29  ;;  %v3878_v49 = vpack.c.bf16 %v1730_v27, %v1729_v26 }
 0xd6d   :  { %1098 = vrot.lane.b32.xlu1 %v1092_v30, %s3507_s5 }
 0xddf   :  { %v1099_v31 = vpop.permute.xlu1 %1098 }
 0xde0   :  { %2954 = vmatmul.mubr.msk.f32.vlgmr.msra.gmra.mrb[10].mxu1 %vm265_vm3, %v1099_v31  ;;  %2965 = vmatmul.mubr.msk.f32.vlgmr.msra.gmra.mrb[16].mxu0 %vm265_vm3, %v1099_v31 }
 0xde1   :  { %3189 = vmatpush3.bf16.msra.mxu1 %v3689_v33  ;;  %3195 = vmatpush3.bf16.msra.mxu0 %v3626_v5 }
 0xde2   :  { %3190 = vmatprep.subr.bf16.mxu1 %v3503_v0  ;;  %3196 = vmatprep.subr.bf16.mxu0 %v3503_v0 }
 0xde3   :  { %2986 = vmatprep.mubr.msk.f32.mxu0 %vm3504_vm0, %v3505_v1  ;;  %2975 = vmatprep.mubr.msk.f32.mxu1 %vm3504_vm0, %v3505_v1 }
 0xde5   :  { %3192 = vmatpush3.bf16.msra.mxu1 %v3705_v38  ;;  %3198 = vmatpush3.bf16.msra.mxu0 %v3642_v10 }
 0xde6   :  { %3205 = vmatprep.subr.bf16.mxu0 %v3503_v0  ;;  %3199 = vmatprep.subr.bf16.mxu1 %v3503_v0 }
 0xeb3   :  { %v3838_v32 = vpop.f32.mrb[10].mxu1  ;;  %v1245_v34 = vpop.f32.mrb[16].mxu0 }
 0xeb4   :  { %v1246_v35 = vadd.f32 %v3661_v13, %v1245_v34  ;;  %v2955_v36 = vpop.f32.mrb[11].mxu1  ;;  %v2966_v37 = vpop.f32.mrb[17].mxu0  ;;  %v3902_v34 = vld [vmem:[#allocation9] ss:$0 sm:$0xff] }
 0xeb6   :  { %1257 = vrot.lane.b32.xlu0 %v1246_v35, %s3506_s21  ;;  %v1249_v40 = vadd.f32 %v1246_v35, %v225_v39 }
 0xeb8   :  { %v2672_v42 = vmul.f32 -1.442695, %v1249_v40 }
 0xeba   :  { %3313 = vpow2.f32 %v2672_v42  ;;  %v3908_v42 = vld [vmem:[#allocation8] ss:$0 sm:$0xff] }
 0xec4   :  { %v3314_v43 = vpop.eup %3313 }
 0xec5   :  { %v1253_v44 = vadd.f32 1.0, %v3314_v43 }
 0xec7   :  { %3315 = vrcp.f32 %v1253_v44 }
 0xed1   :  { %v3316_v45 = vpop.eup %3315 }
 0xed2   :  { %v1267_v57 = vsub.f32 1.0, %v3316_v45  ;;  %v1273_v48 = vmul.f32 %v3316_v45, %v1092_v30 }
 0xf28   :  { %v1258_v47 = vpop.permute.xlu0 %1257 }
 0xf29   :  { %v1260_v52 = vmul.f32 %v3316_v45, %v1258_v47 }
 0xf2b   :  { %1262 = vrot.lane.b32.xlu1 %v1260_v52, %s3506_s21 }
 0xf9d   :  { %v1263_v54 = vpop.permute.xlu1 %1262 }
 0xf9e   :  { %v1265_v55 = vadd.f32 %v1263_v54, %v225_v39  ;;  %v235_v39 = vadd.f32 %v3728_v50, %v3668_v17 }
 0xfa0   :  { %3317 = vtanh.f32 %v1265_v55 }
 0xfaa   :  { %v3318_v56 = vpop.eup %3317 }
 0xfab   :  { %1269 = vrot.lane.b32.xlu0 %v3318_v56, %s3507_s5 }
0x101d   :  { %v1270_v58 = vpop.permute.xlu0 %1269 }
0x101e   :  { %v1272_v59 = vmul.f32 %v1270_v58, %v1267_v57 }
0x1020   :  { %v1274_v60 = vadd.f32 %v1273_v48, %v1272_v59 }
0x1022   :  { %1280 = vrot.lane.b32.xlu1 %v1274_v60, %s3507_s5 }
0x1094   :  { %v1281_v61 = vpop.permute.xlu1 %1280 }
0x1095   :  { %2976 = vmatmul.mubr.msk.f32.vlgmr.msra.gmra.mrb[12].mxu1 %vm265_vm3, %v1281_v61  ;;  %2987 = vmatmul.mubr.msk.f32.vlgmr.msra.gmra.mrb[18].mxu0 %vm265_vm3, %v1281_v61 }
0x1096   :  { %3207 = vmatpush3.bf16.msra.mxu0 %v3626_v5  ;;  %3201 = vmatpush3.bf16.msra.mxu1 %v3689_v33 }
0x1097   :  { %3208 = vmatprep.subr.bf16.mxu0 %v3503_v0  ;;  %3202 = vmatprep.subr.bf16.mxu1 %v3503_v0 }
0x1098   :  { %3008 = vmatprep.mubr.msk.f32.mxu0 %vm3504_vm0, %v3505_v1  ;;  %2997 = vmatprep.mubr.msk.f32.mxu1 %vm3504_vm0, %v3505_v1 }
0x109a   :  { %3210 = vmatpush3.bf16.msra.mxu0 %v3642_v10  ;;  %3204 = vmatpush3.bf16.msra.mxu1 %v3705_v38 }
0x109b   :  { %3217 = vmatprep.subr.bf16.mxu0 %v3503_v0  ;;  %3211 = vmatprep.subr.bf16.mxu1 %v3503_v0 }
0x1168   :  { %v3861_v5 = vpop.f32.mrb[12].mxu1  ;;  %v1427_v62 = vpop.f32.mrb[18].mxu0 }
0x1169   :  { %v1428_v63 = vadd.f32 %v3661_v13, %v1427_v62  ;;  %v2977_v2 = vpop.f32.mrb[13].mxu1  ;;  %v2988_v46 = vpop.f32.mrb[19].mxu0 }
0x116b   :  { %1439 = vrot.lane.b32.xlu0 %v1428_v63, %s3506_s21  ;;  %v1431_v4 = vadd.f32 %v1428_v63, %v230_v3 }
0x116d   :  { %v2675_v10 = vmul.f32 -1.442695, %v1431_v4 }
0x116f   :  { %3319 = vpow2.f32 %v2675_v10 }
0x1179   :  { %v3320_v6 = vpop.eup %3319 }
0x117a   :  { %v1435_v8 = vadd.f32 1.0, %v3320_v6 }
0x117c   :  { %3321 = vrcp.f32 %v1435_v8 }
0x1186   :  { %v3322_v9 = vpop.eup %3321 }
0x1187   :  { %v1449_v19 = vsub.f32 1.0, %v3322_v9  ;;  %v1455_v51 = vmul.f32 %v3322_v9, %v1274_v60 }
0x11dd   :  { %v1440_v11 = vpop.permute.xlu0 %1439 }
0x11de   :  { %v1442_v12 = vmul.f32 %v3322_v9, %v1440_v11 }
0x11e0   :  { %1444 = vrot.lane.b32.xlu1 %v1442_v12, %s3506_s21 }
0x1252   :  { %v1445_v14 = vpop.permute.xlu1 %1444 }
0x1253   :  { %v1447_v15 = vadd.f32 %v1445_v14, %v230_v3 }
0x1255   :  { %3323 = vtanh.f32 %v1447_v15 }
0x125f   :  { %v3324_v18 = vpop.eup %3323 }
0x1260   :  { %1451 = vrot.lane.b32.xlu0 %v3324_v18, %s3507_s5 }
0x12d2   :  { %v1452_v20 = vpop.permute.xlu0 %1451 }
0x12d3   :  { %v1454_v21 = vmul.f32 %v1452_v20, %v1449_v19 }
0x12d5   :  { %v3869_v22 = vadd.f32 %v1455_v51, %v1454_v21 }
0x12d7   :  { %1462 = vrot.lane.b32.xlu1 %v3869_v22, %s3507_s5 }
0x1349   :  { %v1463_v28 = vpop.permute.xlu1 %1462 }
0x134a   :  { %2998 = vmatmul.mubr.msk.f32.vlgmr.msra.gmra.mrb[14].mxu1 %vm265_vm3, %v1463_v28  ;;  %3009 = vmatmul.mubr.msk.f32.vlgmr.msra.gmra.mrb[20].mxu0 %vm265_vm3, %v1463_v28 }
0x134b   :  { %3219 = vmatpush3.bf16.msra.mxu0 %v3873_v25  ;;  %3030 = vmatprep.mubr.msk.f32.mxu0 %vm3504_vm0, %v3505_v1 }
0x134c   :  { %3220 = vmatprep.subr.bf16.mxu0 %v3503_v0  ;;  %3213 = vmatpush3.bf16.msra.mxu1 %v3689_v33 }
0x134d   :  { %3214 = vmatprep.subr.bf16.mxu1 %v3503_v0  ;;  %3019 = vmatprep.mubr.msk.f32.mxu1 %vm3504_vm0, %v3505_v1 }
0x134f   :  { %3222 = vmatpush3.bf16.msra.mxu0 %v3878_v49 }
0x1350   :  { %3216 = vmatpush3.bf16.msra.mxu1 %v3705_v38  ;;  %3229 = vmatprep.subr.bf16.mxu0 %v3503_v0 }
0x1351   :  { %3223 = vmatprep.subr.bf16.mxu1 %v3503_v0 }
0x1352   :  { %3031 = vmatmul.mubr.f32.vlgmr.msra.gmra.mrb[22].mxu0 %v3505_v1 }
0x1353   :  { %3231 = vmatpush3.bf16.msra.mxu0 %v3873_v25  ;;  %3052 = vmatprep.mubr.msk.f32.mxu0 %vm3504_vm0, %v3505_v1 }
0x1354   :  { %3232 = vmatprep.subr.bf16.mxu0 %v3503_v0 }
0x1357   :  { %3234 = vmatpush3.bf16.msra.mxu0 %v3878_v49 }
0x1358   :  { %3241 = vmatprep.subr.bf16.mxu0 %v3503_v0 }
0x141d   :  { %v3898_v33 = vpop.f32.mrb[14].mxu1  ;;  %v1609_v38 = vpop.f32.mrb[20].mxu0 }
0x141e   :  { %v1610_v29 = vadd.f32 %v3661_v13, %v1609_v38  ;;  %v2999_v30 = vpop.f32.mrb[15].mxu1  ;;  %v3010_v31 = vpop.f32.mrb[21].mxu0  ;;  %v441_v13 = vadd.f32 %v3908_v42, %v3746_v53 }
0x1420   :  { %1621 = vrot.lane.b32.xlu0 %v1610_v29, %s3506_s21  ;;  %v1613_v40 = vadd.f32 %v1610_v29, %v235_v39 }
0x1422   :  { %v2678_v43 = vmul.f32 -1.442695, %v1613_v40 }
0x1424   :  { %3325 = vpow2.f32 %v2678_v43 }
0x1425   :  { %v1797_v35 = vpop.f32.mrb[22].mxu0 }
0x1426   :  { %v1798_v36 = vadd.f32 %v3902_v34, %v1797_v35  ;;  %v3032_v37 = vpop.f32.mrb[23].mxu0 }
0x1428   :  { %1809 = vrot.lane.b32.xlu1 %v1798_v36, %s3506_s21  ;;  %v1801_v44 = vadd.f32 %v1798_v36, %v441_v13 }
0x142a   :  { %v2681_v45 = vmul.f32 -1.442695, %v1801_v44 }
0x142c   :  { %3327 = vpow2.f32 %v2681_v45 }
0x142e   :  { %v3326_v47 = vpop.eup %3325 }
0x142f   :  { %v1617_v52 = vadd.f32 1.0, %v3326_v47  ;;  %v805_v47 = vadd.f32 %v3908_v42, %v3792_v41 }
0x1431   :  { %3329 = vrcp.f32 %v1617_v52 }
0x1436   :  { %v3328_v54 = vpop.eup %3327 }
0x1437   :  { %v1805_v55 = vadd.f32 1.0, %v3328_v54 }
0x1439   :  { %3331 = vrcp.f32 %v1805_v55 }
0x143b   :  { %v3330_v56 = vpop.eup %3329 }
0x143c   :  { %v1631_v2 = vsub.f32 1.0, %v3330_v56  ;;  %v1637_v3 = vmul.f32 %v3330_v56, %v3869_v22  ;;  %v623_v22 = vadd.f32 %v3908_v42, %v3769_v16 }
0x1443   :  { %v3332_v50 = vpop.eup %3331 }
0x1444   :  { %v1819_v6 = vsub.f32 1.0, %v3332_v50  ;;  %v1825_v9 = vmul.f32 0.0, %v3332_v50 }
0x1492   :  { %v1622_v57 = vpop.permute.xlu0 %1621 }
0x1493   :  { %v1624_v17 = vmul.f32 %v3330_v56, %v1622_v57 }
0x1495   :  { %1626 = vrot.lane.b32.xlu0 %v1624_v17, %s3506_s21 }
0x149a   :  { %v1810_v58 = vpop.permute.xlu1 %1809 }
0x149b   :  { %v1812_v48 = vmul.f32 %v3332_v50, %v1810_v58 }
0x149d   :  { %1814 = vrot.lane.b32.xlu1 %v1812_v48, %s3506_s21 }
0x1507   :  { %v1627_v53 = vpop.permute.xlu0 %1626 }
0x1508   :  { %v1629_v59 = vadd.f32 %v1627_v53, %v235_v39 }
0x150a   :  { %3333 = vtanh.f32 %v1629_v59 }
0x150f   :  { %v1815_v60 = vpop.permute.xlu1 %1814 }
0x1510   :  { %v1817_v61 = vadd.f32 %v1815_v60, %v441_v13 }
0x1512   :  { %3335 = vtanh.f32 %v1817_v61 }
0x1514   :  { %v3334_v62 = vpop.eup %3333 }
0x1515   :  { %1633 = vrot.lane.b32.xlu0 %v3334_v62, %s3507_s5 }
0x151c   :  { %v3336_v63 = vpop.eup %3335 }
0x151d   :  { %1821 = vrot.lane.b32.xlu1 %v3336_v63, %s3507_s5 }
0x1587   :  { %v1634_v46 = vpop.permute.xlu0 %1633 }
0x1588   :  { %v1636_v4 = vmul.f32 %v1634_v46, %v1631_v2 }
0x158a   :  { %v1638_v10 = vadd.f32 %v1637_v3, %v1636_v4  ;;  %v987_v4 = vadd.f32 %v3908_v42, %v3815_v7 }
0x158c   :  { %1644 = vrot.lane.b32.xlu0 %v1638_v10, %s3507_s5 }
0x158f   :  { %v1822_v8 = vpop.permute.xlu1 %1821 }
0x1590   :  { %v1824_v11 = vmul.f32 %v1822_v8, %v1819_v6 }
0x1592   :  { %v1826_v12 = vadd.f32 %v1825_v9, %v1824_v11 }
0x1594   :  { %1829 = vrot.lane.b32.xlu1 %v1826_v12, %s3507_s5 }
0x15fe   :  { %v1645_v14 = vpop.permute.xlu0 %1644 }
0x15ff   :  { %3020 = vmatmul.mubr.msk.f32.vlgmr.msra.gmra.mrb[16].mxu1 %vm265_vm3, %v1645_v14 }
0x1600   :  { %3225 = vmatpush3.bf16.msra.mxu1 %v3873_v25  ;;  %3041 = vmatprep.mubr.msk.f32.mxu1 %vm3504_vm0, %v3505_v1 }
0x1601   :  { %3226 = vmatprep.subr.bf16.mxu1 %v3503_v0 }
0x1604   :  { %3228 = vmatpush3.bf16.msra.mxu1 %v3878_v49 }
0x1605   :  { %3235 = vmatprep.subr.bf16.mxu1 %v3503_v0 }
0x1606   :  { %v1830_v15 = vpop.permute.xlu1 %1829 }
0x1607   :  { %3042 = vmatmul.mubr.msk.f32.vlgmr.msra.gmra.mrb[18].mxu1 %vm265_vm3, %v1830_v15 }
0x1608   :  { %3237 = vmatpush3.bf16.msra.mxu1 %v3873_v25  ;;  %3063 = vmatprep.mubr.msk.f32.mxu1 %vm3504_vm0, %v3505_v1 }
0x1609   :  { %3238 = vmatprep.subr.bf16.mxu1 %v3503_v0 }
0x160c   :  { %3240 = vmatpush3.bf16.msra.mxu1 %v3878_v49 }
0x160d   :  { %3247 = vmatprep.subr.bf16.mxu1 %v3503_v0 }
0x16d2   :  { %v3933_v18 = vpop.f32.mrb[16].mxu1 }
0x16d3   :  { %v3021_v19 = vpop.f32.mrb[17].mxu1 }
0x16da   :  { %v1899_v20 = vpop.f32.mrb[18].mxu1 }
0x16db   :  { %v1900_v51 = vadd.f32 %v3902_v34, %v1899_v20  ;;  %v3043_v21 = vpop.f32.mrb[19].mxu1 }
0x16dd   :  { %1911 = vrot.lane.b32.xlu0 %v1900_v51, %s3506_s21  ;;  %v1903_v23 = vadd.f32 %v1900_v51, %v623_v22 }
0x16df   :  { %v2683_v24 = vmul.f32 -1.442695, %v1903_v23 }
0x16e1   :  { %3337 = vpow2.f32 %v2683_v24 }
0x16eb   :  { %v3338_v26 = vpop.eup %3337 }
0x16ec   :  { %v1907_v27 = vadd.f32 1.0, %v3338_v26 }
0x16ee   :  { %3339 = vrcp.f32 %v1907_v27 }
0x16f8   :  { %v3340_v28 = vpop.eup %3339 }
0x16f9   :  { %v1921_v36 = vsub.f32 1.0, %v3340_v28  ;;  %v1927_v16 = vmul.f32 %v3340_v28, %v1826_v12 }
0x174f   :  { %v1912_v38 = vpop.permute.xlu0 %1911 }
0x1750   :  { %v1914_v29 = vmul.f32 %v3340_v28, %v1912_v38  ;;  %v1169_v38 = vadd.f32 %v3908_v42, %v3838_v32 }
0x1752   :  { %1916 = vrot.lane.b32.xlu1 %v1914_v29, %s3506_s21 }
0x17c4   :  { %v1917_v30 = vpop.permute.xlu1 %1916 }
0x17c5   :  { %v1919_v31 = vadd.f32 %v1917_v30, %v623_v22 }
0x17c7   :  { %3341 = vtanh.f32 %v1919_v31 }
0x17d1   :  { %v3342_v35 = vpop.eup %3341 }
0x17d2   :  { %1923 = vrot.lane.b32.xlu0 %v3342_v35, %s3507_s5 }
0x1844   :  { %v1924_v37 = vpop.permute.xlu0 %1923 }
0x1845   :  { %v1926_v39 = vmul.f32 %v1924_v37, %v1921_v36 }
0x1847   :  { %v1928_v40 = vadd.f32 %v1927_v16, %v1926_v39 }
0x1849   :  { %1931 = vrot.lane.b32.xlu1 %v1928_v40, %s3507_s5 }
0x18bb   :  { %v1932_v43 = vpop.permute.xlu1 %1931 }
0x18bc   :  { %3053 = vmatmul.mubr.msk.f32.vlgmr.msra.gmra.mrb[24].mxu0 %vm265_vm3, %v1932_v43 }
0x18bd   :  { %3243 = vmatpush3.bf16.msra.mxu0 %v3873_v25  ;;  %3074 = vmatprep.mubr.msk.f32.mxu0 %vm3504_vm0, %v3505_v1 }
0x18be   :  { %3244 = vmatprep.subr.bf16.mxu0 %v3503_v0 }
0x18c1   :  { %3246 = vmatpush3.bf16.msra.mxu0 %v3878_v49 }
0x18c2   :  { %3253 = vmatprep.subr.bf16.mxu0 %v3503_v0 }
0x198f   :  { %v2001_v13 = vpop.f32.mrb[24].mxu0 }
0x1990   :  { %v2002_v44 = vadd.f32 %v3902_v34, %v2001_v13  ;;  %v3054_v45 = vpop.f32.mrb[25].mxu0 }
0x1992   :  { %2013 = vrot.lane.b32.xlu0 %v2002_v44, %s3506_s21  ;;  %v2005_v52 = vadd.f32 %v2002_v44, %v805_v47 }
0x1994   :  { %v2685_v54 = vmul.f32 -1.442695, %v2005_v52 }
0x1996   :  { %3343 = vpow2.f32 %v2685_v54 }
0x19a0   :  { %v3344_v55 = vpop.eup %3343 }
0x19a1   :  { %v2009_v56 = vadd.f32 1.0, %v3344_v55 }
0x19a3   :  { %3345 = vrcp.f32 %v2009_v56 }
0x19ad   :  { %v3346_v57 = vpop.eup %3345 }
0x19ae   :  { %v2023_v59 = vsub.f32 1.0, %v3346_v57  ;;  %v2029_v41 = vmul.f32 %v3346_v57, %v1928_v40 }
0x1a04   :  { %v2014_v17 = vpop.permute.xlu0 %2013 }
0x1a05   :  { %v2016_v50 = vmul.f32 %v3346_v57, %v2014_v17  ;;  %v1351_v57 = vadd.f32 %v3908_v42, %v3861_v5 }
0x1a07   :  { %2018 = vrot.lane.b32.xlu1 %v2016_v50, %s3506_s21 }
0x1a79   :  { %v2019_v58 = vpop.permute.xlu1 %2018 }
0x1a7a   :  { %v2021_v48 = vadd.f32 %v2019_v58, %v805_v47 }
0x1a7c   :  { %3347 = vtanh.f32 %v2021_v48 }
0x1a86   :  { %v3348_v53 = vpop.eup %3347 }
0x1a87   :  { %2025 = vrot.lane.b32.xlu0 %v3348_v53, %s3507_s5 }
0x1af9   :  { %v2026_v60 = vpop.permute.xlu0 %2025 }
0x1afa   :  { %v2028_v61 = vmul.f32 %v2026_v60, %v2023_v59 }
0x1afc   :  { %v2030_v62 = vadd.f32 %v2029_v41, %v2028_v61 }
0x1afe   :  { %2033 = vrot.lane.b32.xlu1 %v2030_v62, %s3507_s5 }
0x1b70   :  { %v2034_v63 = vpop.permute.xlu1 %2033 }
0x1b71   :  { %3064 = vmatmul.mubr.msk.f32.vlgmr.msra.gmra.mrb[20].mxu1 %vm265_vm3, %v2034_v63 }
0x1b72   :  { %3249 = vmatpush3.bf16.msra.mxu1 %v3873_v25  ;;  %3085 = vmatprep.mubr.msk.f32.mxu1 %vm3504_vm0, %v3505_v1 }
0x1b73   :  { %3250 = vmatprep.subr.bf16.mxu1 %v3503_v0 }
0x1b76   :  { %3252 = vmatpush3.bf16.msra.mxu1 %v3878_v49 }
0x1b77   :  { %3259 = vmatprep.subr.bf16.mxu1 %v3503_v0 }
0x1c44   :  { %v2103_v2 = vpop.f32.mrb[20].mxu1 }
0x1c45   :  { %v2104_v46 = vadd.f32 %v3902_v34, %v2103_v2  ;;  %v3065_v3 = vpop.f32.mrb[21].mxu1 }
0x1c47   :  { %2115 = vrot.lane.b32.xlu0 %v2104_v46, %s3506_s21  ;;  %v2107_v10 = vadd.f32 %v2104_v46, %v987_v4 }
0x1c49   :  { %v2687_v6 = vmul.f32 -1.442695, %v2107_v10 }
0x1c4b   :  { %3349 = vpow2.f32 %v2687_v6  ;;  %v1533_v6 = vadd.f32 %v3908_v42, %v3898_v33 }
0x1c55   :  { %v3350_v8 = vpop.eup %3349 }
0x1c56   :  { %v2111_v9 = vadd.f32 1.0, %v3350_v8 }
0x1c58   :  { %3351 = vrcp.f32 %v2111_v9 }
0x1c62   :  { %v3352_v11 = vpop.eup %3351 }
0x1c63   :  { %v2125_v51 = vsub.f32 1.0, %v3352_v11  ;;  %v2131_v7 = vmul.f32 %v3352_v11, %v2030_v62 }
0x1cb9   :  { %v2116_v12 = vpop.permute.xlu0 %2115 }
0x1cba   :  { %v2118_v14 = vmul.f32 %v3352_v11, %v2116_v12 }
0x1cbc   :  { %2120 = vrot.lane.b32.xlu1 %v2118_v14, %s3506_s21 }
0x1d2e   :  { %v2121_v15 = vpop.permute.xlu1 %2120 }
0x1d2f   :  { %v2123_v19 = vadd.f32 %v2121_v15, %v987_v4 }
0x1d31   :  { %3353 = vtanh.f32 %v2123_v19 }
0x1d3b   :  { %v3354_v20 = vpop.eup %3353 }
0x1d3c   :  { %2127 = vrot.lane.b32.xlu0 %v3354_v20, %s3507_s5 }
0x1dae   :  { %v2128_v21 = vpop.permute.xlu0 %2127 }
0x1daf   :  { %v2130_v22 = vmul.f32 %v2128_v21, %v2125_v51 }
0x1db1   :  { %v2132_v23 = vadd.f32 %v2131_v7, %v2130_v22 }
0x1db3   :  { %2135 = vrot.lane.b32.xlu1 %v2132_v23, %s3507_s5 }
0x1e25   :  { %v2136_v24 = vpop.permute.xlu1 %2135 }
0x1e26   :  { %3075 = vmatmul.mubr.msk.f32.vlgmr.msra.gmra.mrb[26].mxu0 %vm265_vm3, %v2136_v24 }
0x1e27   :  { %3255 = vmatpush3.bf16.msra.mxu0 %v3873_v25  ;;  %3096 = vmatprep.mubr.msk.f32.mxu0 %vm3504_vm0, %v3505_v1 }
0x1e28   :  { %3256 = vmatprep.subr.bf16.mxu0 %v3503_v0 }
0x1e2b   :  { %3258 = vmatpush3.bf16.msra.mxu0 %v3878_v49 }
0x1e2c   :  { %3265 = vmatprep.subr.bf16.mxu0 %v3503_v0 }
0x1ef9   :  { %v2205_v26 = vpop.f32.mrb[26].mxu0 }
0x1efa   :  { %v2206_v27 = vadd.f32 %v3902_v34, %v2205_v26  ;;  %v3076_v28 = vpop.f32.mrb[27].mxu0 }
0x1efc   :  { %2217 = vrot.lane.b32.xlu0 %v2206_v27, %s3506_s21  ;;  %v2209_v29 = vadd.f32 %v2206_v27, %v1169_v38 }
0x1efe   :  { %v2689_v30 = vmul.f32 -1.442695, %v2209_v29 }
0x1f00   :  { %3355 = vpow2.f32 %v2689_v30 }
0x1f0a   :  { %v3356_v31 = vpop.eup %3355 }
0x1f0b   :  { %v2213_v35 = vadd.f32 1.0, %v3356_v31 }
0x1f0d   :  { %3357 = vrcp.f32 %v2213_v35 }
0x1f17   :  { %v3358_v36 = vpop.eup %3357 }
0x1f18   :  { %v2227_v13 = vsub.f32 1.0, %v3358_v36  ;;  %v2233_v32 = vmul.f32 %v3358_v36, %v2132_v23 }
0x1f6e   :  { %v2218_v37 = vpop.permute.xlu0 %2217 }
0x1f6f   :  { %v2220_v16 = vmul.f32 %v3358_v36, %v2218_v37 }
0x1f71   :  { %2222 = vrot.lane.b32.xlu1 %v2220_v16, %s3506_s21 }
0x1fe3   :  { %v2223_v39 = vpop.permute.xlu1 %2222 }
0x1fe4   :  { %v2225_v40 = vadd.f32 %v2223_v39, %v1169_v38  ;;  %v1715_v38 = vadd.f32 %v3908_v42, %v3933_v18  ;;  %v2542_v42 = vld [vmem:[%s4053_s9 + $0x8] sm:$0xff]  ;;  %v2543_v18 = vld [vmem:[%s4053_s9 + $0x10] sm:$0xff] }
0x1fe6   :  { %3359 = vtanh.f32 %v2225_v40 }
0x1ff0   :  { %v3360_v43 = vpop.eup %3359 }
0x1ff1   :  { %2229 = vrot.lane.b32.xlu0 %v3360_v43, %s3507_s5 }
0x2063   :  { %v2230_v44 = vpop.permute.xlu0 %2229 }
0x2064   :  { %v2232_v45 = vmul.f32 %v2230_v44, %v2227_v13  ;;  %v2544_v13 = vld [vmem:[%s4053_s9 + $0x18] sm:$0xff] }
0x2065   :  { %v3269_v44 = vpack.c.bf16 %v2544_v13, %v2543_v18 }
0x2066   :  { %v2234_v47 = vadd.f32 %v2233_v32, %v2232_v45 }
0x2068   :  { %2237 = vrot.lane.b32.xlu1 %v2234_v47, %s3507_s5 }
0x20da   :  { %v2238_v52 = vpop.permute.xlu1 %2237 }
0x20db   :  { %3086 = vmatmul.mubr.msk.f32.vlgmr.msra.gmra.mrb[22].mxu1 %vm265_vm3, %v2238_v52 }
0x20dc   :  { %3261 = vmatpush3.bf16.msra.mxu1 %v3873_v25  ;;  %3107 = vmatprep.mubr.msk.f32.mxu1 %vm3504_vm0, %v3505_v1 }
0x20dd   :  { %3262 = vmatprep.subr.bf16.mxu1 %v3503_v0 }
0x20e0   :  { %3264 = vmatpush3.bf16.msra.mxu1 %v3878_v49 }
0x21ae   :  { %v2307_v54 = vpop.f32.mrb[22].mxu1 }
0x21af   :  { %v2308_v55 = vadd.f32 %v3902_v34, %v2307_v54  ;;  %v3087_v56 = vpop.f32.mrb[23].mxu1 }
0x21b1   :  { %2319 = vrot.lane.b32.xlu0 %v2308_v55, %s3506_s21  ;;  %v2311_v17 = vadd.f32 %v2308_v55, %v1351_v57 }
0x21b3   :  { %v2691_v50 = vmul.f32 -1.442695, %v2311_v17 }
0x21b5   :  { %3361 = vpow2.f32 %v2691_v50 }
0x21bf   :  { %v3362_v25 = vpop.eup %3361 }
0x21c0   :  { %v2315_v58 = vadd.f32 1.0, %v3362_v25 }
0x21c2   :  { %3363 = vrcp.f32 %v2315_v58 }
0x21cc   :  { %v3364_v48 = vpop.eup %3363 }
0x21cd   :  { %v2329_v61 = vsub.f32 1.0, %v3364_v48  ;;  %v2335_v5 = vmul.f32 %v3364_v48, %v2234_v47 }
0x2223   :  { %v2320_v53 = vpop.permute.xlu0 %2319 }
0x2224   :  { %v2322_v59 = vmul.f32 %v3364_v48, %v2320_v53 }
0x2226   :  { %2324 = vrot.lane.b32.xlu1 %v2322_v59, %s3506_s21 }
0x2298   :  { %v2325_v49 = vpop.permute.xlu1 %2324 }
0x2299   :  { %v2327_v60 = vadd.f32 %v2325_v49, %v1351_v57  ;;  %v2696_v57 = vld [vmem:[%s4054_s10] ss:$0 sm:$0xff] }
0x229b   :  { %3365 = vtanh.f32 %v2327_v60 }
0x22a5   :  { %v3366_v41 = vpop.eup %3365 }
0x22a6   :  { %2331 = vrot.lane.b32.xlu0 %v3366_v41, %s3507_s5 }
0x2318   :  { %v2332_v62 = vpop.permute.xlu0 %2331 }
0x2319   :  { %v2334_v63 = vmul.f32 %v2332_v62, %v2329_v61 }
0x231b   :  { %v2336_v2 = vadd.f32 %v2335_v5, %v2334_v63 }
0x231d   :  { %2339 = vrot.lane.b32.xlu1 %v2336_v2, %s3507_s5 }
0x238f   :  { %v2340_v46 = vpop.permute.xlu1 %2339 }
0x2390   :  { %3097 = vmatmul.mubr.msk.f32.vlgmr.msra.gmra.mrb[28].mxu0 %vm265_vm3, %v2340_v46 }
0x2391   :  { %3118 = vmatprep.mubr.msk.f32.mxu0 %vm3504_vm0, %v3505_v1 }
0x2463   :  { %v2409_v3 = vpop.f32.mrb[28].mxu0 }
0x2464   :  { %v2410_v4 = vadd.f32 %v3902_v34, %v2409_v3  ;;  %v3098_v10 = vpop.f32.mrb[29].mxu0 }
0x2466   :  { %2421 = vrot.lane.b32.xlu0 %v2410_v4, %s3506_s21  ;;  %v2413_v8 = vadd.f32 %v2410_v4, %v1533_v6 }
0x2468   :  { %v2693_v9 = vmul.f32 -1.442695, %v2413_v8 }
0x246a   :  { %3367 = vpow2.f32 %v2693_v9 }
0x2474   :  { %v3368_v11 = vpop.eup %3367 }
0x2475   :  { %v2417_v12 = vadd.f32 1.0, %v3368_v11 }
0x2477   :  { %3369 = vrcp.f32 %v2417_v12 }
0x2481   :  { %v3370_v14 = vpop.eup %3369 }
0x2482   :  { %v2431_v21 = vsub.f32 1.0, %v3370_v14  ;;  %v2437_v33 = vmul.f32 %v3370_v14, %v2336_v2 }
0x24d8   :  { %v2422_v15 = vpop.permute.xlu0 %2421 }
0x24d9   :  { %v2424_v19 = vmul.f32 %v3370_v14, %v2422_v15 }
0x24db   :  { %2426 = vrot.lane.b32.xlu1 %v2424_v19, %s3506_s21 }
0x254d   :  { %v2427_v1 = vpop.permute.xlu1 %2426 }
0x254e   :  { %v2429_v20 = vadd.f32 %v2427_v1, %v1533_v6 }
0x2550   :  { %3371 = vtanh.f32 %v2429_v20 }
0x255a   :  { %v3372_v51 = vpop.eup %3371 }
0x255b   :  { %2433 = vrot.lane.b32.xlu0 %v3372_v51, %s3507_s5 }
0x25cd   :  { %v2434_v7 = vpop.permute.xlu0 %2433 }
0x25ce   :  { %v2436_v22 = vmul.f32 %v2434_v7, %v2431_v21 }
0x25d0   :  { %v2438_v23 = vadd.f32 %v2437_v33, %v2436_v22 }
0x25d2   :  { %2441 = vrot.lane.b32.xlu1 %v2438_v23, %s3507_s5 }
0x2644   :  { %v2442_v24 = vpop.permute.xlu1 %2441 }
0x2645   :  { %3108 = vmatmul.mubr.msk.f32.vlgmr.msra.gmra.mrb[24].mxu1 %vm265_vm3, %v2442_v24 }
0x2718   :  { %v2511_v26 = vpop.f32.mrb[24].mxu1 }
0x2719   :  { %v2512_v27 = vadd.f32 %v3902_v34, %v2511_v26  ;;  %v3109_v28 = vpop.f32.mrb[25].mxu1  ;;  %v2541_v34 = vld [vmem:[%s4053_s9] sm:$0xff] }
0x271a   :  { %v3266_v43 = vpack.c.bf16 %v2542_v42, %v2541_v34 }
0x271b   :  { %2523 = vrot.lane.b32.xlu0 %v2512_v27, %s3506_s21  ;;  %v2515_v29 = vadd.f32 %v2512_v27, %v1715_v38 }
0x271c   :  { %3267 = vmatpush3.bf16.msra.mxu0 %v3266_v43 }
0x271d   :  { %v2695_v30 = vmul.f32 -1.442695, %v2515_v29  ;;  %3268 = vmatprep.subr.bf16.mxu0 %v3503_v0 }
0x271f   :  { %3373 = vpow2.f32 %v2695_v30 }
0x2720   :  { %3270 = vmatpush3.bf16.msra.mxu0 %v3269_v44 }
0x2729   :  { %v3374_v31 = vpop.eup %3373 }
0x272a   :  { %v2519_v35 = vadd.f32 1.0, %v3374_v31 }
0x272c   :  { %3375 = vrcp.f32 %v2519_v35 }
0x2736   :  { %v3376_v36 = vpop.eup %3375 }
0x2737   :  { %v2533_v45 = vsub.f32 1.0, %v3376_v36  ;;  %v2539_v52 = vmul.f32 %v3376_v36, %v2438_v23 }
0x278d   :  { %v2524_v37 = vpop.permute.xlu0 %2523 }
0x278e   :  { %v2526_v16 = vmul.f32 %v3376_v36, %v2524_v37 }
0x2790   :  { %2528 = vrot.lane.b32.xlu1 %v2526_v16, %s3506_s21 }
0x2802   :  { %v2529_v39 = vpop.permute.xlu1 %2528 }
0x2803   :  { %v2531_v40 = vadd.f32 %v2529_v39, %v1715_v38 }
0x2805   :  { %3377 = vtanh.f32 %v2531_v40 }
0x280f   :  { %v3378_v32 = vpop.eup %3377 }
0x2810   :  { %2535 = vrot.lane.b32.xlu0 %v3378_v32, %s3507_s5 }
0x2882   :  { %v2536_v47 = vpop.permute.xlu0 %2535 }
0x2883   :  { %v2538_v54 = vmul.f32 %v2536_v47, %v2533_v45 }
0x2885   :  { %v2540_v55 = vadd.f32 %v2539_v52, %v2538_v54 }
0x2887   :  { %2553 = vrot.lane.b32.xlu1 %v2540_v55, %s3507_s5 }
0x28f9   :  { %v2554_v56 = vpop.permute.xlu1 %2553 }
0x28fa   :  { %3119 = vmatmul.mubr.msk.f32.vlgmr.msra.gmra.mrb[30].mxu0 %vm265_vm3, %v2554_v56 }
0x29cd   :  { %v2623_v0 = vpop.f32.mrb[30].mxu0 }
0x29ce   :  { %v2624_v17 = vadd.f32 %v2696_v57, %v2623_v0  ;;  %v3120_v50 = vpop.f32.mrb[31].mxu0 }
0x29d0   :  { %2627 = vst [vmem:[#allocation11] sm:$0xff] %v2624_v17 }
0x29d1   :  { %3478 = shalt.err (!%p3475_p8)
}
0x29d2   :  { %s3479_s15 = scalar_lea.hbm %s4055_s11, 128 }
0x29d3   :  { %p3480_p9 = scmp.ne.s32.totalorder %s4055_s11, %s3479_s15  ;;  %p3483_p10 = scmp.lt.u32.totalorder %s3479_s15, %s4055_s11 }
0x29d5   :  { %p3485_p11 = pnand %p3483_p10, %p3480_p9 }
0x29d7   :  { %3488 = shalt.err (!%p3485_p11)
}
0x29d8   :  { %2637 = dma.vmem_to_hbm [thread:$0]  %s2635_s18, 128, %s4055_s11, [#allocation5]  }
0x29d9   :  { %3495 = dma.done.wait [#allocation5], 128  }
0x29da   :  { %3496 = vsyncadd [#allocation5], 4294967168 }
0x29db   :  { %2641 = vsyncpa [#allocation4], 1 }
0x29dc   :  { %2642 = vsyncpa [#allocation7], 1 }
0x29dd   :  { %2643 = vsyncpa [#allocation10], 1 }
0x29de   :  { %2644 = vsyncpa [#allocation5], 1 }

</bundles_post_ra>
